<compile_context>
chip_gen: v7x
topology: tpu7x:2x2x1
jax: 0.10.0
libtpu: 0.0.40
codegen_flags: <defaults>
</compile_context>

<pallas_src>
import functools
import math

import jax
import jax.numpy as jnp
from jax.experimental import pallas as pl
from jax.experimental.pallas import tpu as pltpu

_VMEM_LIMIT = 64 * 1024 * 1024   # raised scoped-VMEM budget for the matmul kernels (fits v7x too)


def _pick_bm(m, block_m):
    """Row tile for the M-tiled matmul kernels.  Full M if it fits in one block
    (full-dim blocks are always legal), otherwise a multiple of 16 (bf16 sublane
    packing).  The ragged last block is handled by Pallas, no jnp.pad copy."""
    if m <= block_m:
        return m
    return max(16, (block_m // 16) * 16)


# --------------------------------------------------------------------------
# Fused Q/K/V projection: one HBM read of x, three MXU matmuls, bf16 outputs.
# --------------------------------------------------------------------------
def _qkv_kernel(x_ref, wq_ref, wk_ref, wv_ref, q_ref, k_ref, v_ref):
    x = x_ref[...]
    q_ref[...] = jnp.dot(x, wq_ref[...], preferred_element_type=jnp.float32).astype(q_ref.dtype)
    k_ref[...] = jnp.dot(x, wk_ref[...], preferred_element_type=jnp.float32).astype(k_ref.dtype)
    v_ref[...] = jnp.dot(x, wv_ref[...], preferred_element_type=jnp.float32).astype(v_ref.dtype)


def pallas_qkv(x, wq, wk, wv, *, block_m=512):
    m, d_in = x.shape
    nq, nk, nv = wq.shape[1], wk.shape[1], wv.shape[1]
    bm = _pick_bm(m, block_m)
    return pl.pallas_call(
        _qkv_kernel,
        grid=(pl.cdiv(m, bm),),
        in_specs=[
            pl.BlockSpec((bm, d_in), lambda i: (i, 0)),
            pl.BlockSpec((d_in, nq), lambda i: (0, 0)),     # resident weights
            pl.BlockSpec((d_in, nk), lambda i: (0, 0)),
            pl.BlockSpec((d_in, nv), lambda i: (0, 0)),
        ],
        out_specs=[
            pl.BlockSpec((bm, nq), lambda i: (i, 0)),
            pl.BlockSpec((bm, nk), lambda i: (i, 0)),
            pl.BlockSpec((bm, nv), lambda i: (i, 0)),
        ],
        out_shape=[
            jax.ShapeDtypeStruct((m, nq), jnp.bfloat16),
            jax.ShapeDtypeStruct((m, nk), jnp.bfloat16),
            jax.ShapeDtypeStruct((m, nv), jnp.bfloat16),
        ],
        compiler_params=pltpu.CompilerParams(
            dimension_semantics=("parallel",), vmem_limit_bytes=_VMEM_LIMIT),
    )(x.astype(jnp.bfloat16), wq.astype(jnp.bfloat16),
      wk.astype(jnp.bfloat16), wv.astype(jnp.bfloat16))


# --------------------------------------------------------------------------
# Fused feed-forward (conv1 1x1 -> activation -> conv2 1x1, both bias-free).
# --------------------------------------------------------------------------
def _ffn_kernel(x_ref, w1_ref, w2_ref, o_ref, *, activation):
    h = jnp.dot(x_ref[...], w1_ref[...], preferred_element_type=jnp.float32)
    h = activation(h)
    o_ref[...] = jnp.dot(h.astype(w2_ref.dtype), w2_ref[...],
                         preferred_element_type=jnp.float32).astype(o_ref.dtype)


def pallas_ffn(x, w1, w2, *, activation, block_m=512):
    """conv1 -> activation -> conv2 fused; the (bm, d_ff) intermediate never leaves VMEM."""
    m, d_in = x.shape
    d_ff, d_out = w1.shape[1], w2.shape[1]
    bm = _pick_bm(m, block_m)
    return pl.pallas_call(
        functools.partial(_ffn_kernel, activation=activation),
        grid=(pl.cdiv(m, bm),),
        in_specs=[
            pl.BlockSpec((bm, d_in), lambda i: (i, 0)),
            pl.BlockSpec((d_in, d_ff), lambda i: (0, 0)),
            pl.BlockSpec((d_ff, d_out), lambda i: (0, 0)),
        ],
        out_specs=pl.BlockSpec((bm, d_out), lambda i: (i, 0)),
        out_shape=jax.ShapeDtypeStruct((m, d_out), jnp.bfloat16),
        compiler_params=pltpu.CompilerParams(
            dimension_semantics=("parallel",), vmem_limit_bytes=_VMEM_LIMIT),
    )(x.astype(jnp.bfloat16), w1.astype(jnp.bfloat16), w2.astype(jnp.bfloat16))


# --------------------------------------------------------------------------
# Fused residual-add + series decomposition (moving average with replicate
# padding done in-kernel).  Returns the residual part (and optionally a+b).
# --------------------------------------------------------------------------
def _sliding_window_sum(xp, out_len, k):
    """out[l] = sum_{t=l}^{l+k-1} xp[t].  Shared dyadic partial sums: ~log2(k)
    full-width VPU adds instead of k-1 (feedback: share partial window sums)."""
    sums = {1: xp}
    p = 1
    while 2 * p <= k:
        prev = sums[p]
        sums[2 * p] = prev[:-p] + prev[p:]
        p *= 2
    out = None
    off = 0
    rem = k
    for pw in sorted(sums.keys(), reverse=True):
        while rem >= pw:
            seg = sums[pw][off:off + out_len]
            out = seg if out is None else out + seg
            off += pw
            rem -= pw
    return out


def _add_decomp_kernel(*refs, kernel_size, pad, output_sum):
    if output_sum:
        a_ref, b_ref, res_ref, sum_ref = refs
    else:
        a_ref, b_ref, res_ref = refs
    s = a_ref[...].astype(jnp.float32) + b_ref[...].astype(jnp.float32)   # (L, D)
    L, D = s.shape
    if pad > 0:
        xp = jnp.concatenate([
            jnp.broadcast_to(s[0:1, :], (pad, D)),       # replicate front edge
            s,
            jnp.broadcast_to(s[L - 1:L, :], (pad, D)),   # replicate back edge
        ], axis=0)                                        # (L + 2*pad, D)
    else:
        xp = s
    win = _sliding_window_sum(xp, L, kernel_size)
    res_ref[...] = (s - win * (1.0 / kernel_size)).astype(res_ref.dtype)
    if output_sum:
        sum_ref[...] = s.astype(sum_ref.dtype)


def fused_add_decomp(a, b, kernel_size, *, output_sum, res_dtype):
    """series_decomp(a + b) residual; optionally also returns (a + b) so the
    residual stream never needs a separate XLA add / HBM round-trip."""
    assert kernel_size % 2 == 1, "moving_avg kernel must be odd"
    B, L, D = a.shape
    pad = (kernel_size - 1) // 2
    out_shapes = [jax.ShapeDtypeStruct((B, L, D), res_dtype)]
    out_specs = [pl.BlockSpec((pl.Squeezed(), L, D), lambda i: (i, 0, 0))]
    if output_sum:
        out_shapes.append(jax.ShapeDtypeStruct((B, L, D), jnp.float32))
        out_specs.append(pl.BlockSpec((pl.Squeezed(), L, D), lambda i: (i, 0, 0)))
    # TODO(synk): v7x-only idea (MXU banded-averaging matmul, L-chunked grid with halos) not done;
    # the dyadic shared sums already cut the VPU add chain ~4x.
    outs = pl.pallas_call(
        functools.partial(_add_decomp_kernel, kernel_size=kernel_size, pad=pad,
                          output_sum=output_sum),
        grid=(B,),
        in_specs=[pl.BlockSpec((pl.Squeezed(), L, D), lambda i: (i, 0, 0)),
                  pl.BlockSpec((pl.Squeezed(), L, D), lambda i: (i, 0, 0))],
        out_specs=out_specs,
        out_shape=out_shapes,
        compiler_params=pltpu.CompilerParams(dimension_semantics=("parallel",)),
    )(a, b)
    if output_sum:
        return outs[0], outs[1]
    return outs[0]


# --------------------------------------------------------------------------
# Time-delay aggregation fused with the output projection.
# --------------------------------------------------------------------------
def _pick_l_chunk(L):
    for c in (256, 128):
        if L > c and L % c == 0:
            return c
    return L


def _agg_project_kernel(delay_ref, w_ref, v_ref, wo_ref, o_ref, v2_ref, *, top_k, chunk):
    # out[l] = (sum_i w_i * V[(l + d_i) % L]) @ wo, computed per L-chunk.
    b = pl.program_id(0)
    lc = pl.program_id(1)
    L, hd = v_ref.shape

    @pl.when(lc == 0)                      # double V into VMEM once per batch (no HBM concat)
    def _():
        vv = v_ref[...].astype(jnp.float32)
        v2_ref[0:L, :] = vv
        v2_ref[L:2 * L, :] = vv

    base = lc * chunk
    acc = jnp.zeros((chunk, hd), jnp.float32)
    for i in range(top_k):                 # top_k ~ log(L): static unroll
        d = delay_ref[b, i]                # scalar from SMEM
        c = w_ref[b, i]                    # scalar from SMEM
        acc = acc + v2_ref[pl.ds(base + d, chunk), :] * c
    o_ref[...] = jnp.dot(acc.astype(wo_ref.dtype), wo_ref[...],
                         preferred_element_type=jnp.float32).astype(o_ref.dtype)


def time_delay_agg_project(values, delay, weights, wo):
    """out[b] = (sum_i weights[b, i] * roll(values[b], -delay[b, i], axis=time)) @ wo.

    Delays / softmax weights are scalar-prefetched into SMEM; V is DMA'd once per batch and
    doubled into a VMEM scratch, each roll is a dynamic `pl.ds` slice of that scratch, and the
    accumulate + wo projection are chunked over L so no (B, L, L) circulant nor a large live
    f32 accumulator is ever formed.  wo stays resident in VMEM across the whole grid."""
    B, L, HD = values.shape
    d_model = wo.shape[1]
    top_k = delay.shape[1]
    chunk = _pick_l_chunk(L)
    return pl.pallas_call(
        functools.partial(_agg_project_kernel, top_k=top_k, chunk=chunk),
        grid_spec=pltpu.PrefetchScalarGridSpec(
            num_scalar_prefetch=2,
            grid=(B, L // chunk),
            in_specs=[
                pl.BlockSpec((pl.Squeezed(), L, HD), lambda b, lc, d, w: (b, 0, 0)),
                pl.BlockSpec((HD, d_model), lambda b, lc, d, w: (0, 0)),
            ],
            out_specs=pl.BlockSpec((pl.Squeezed(), chunk, d_model),
                                   lambda b, lc, d, w: (b, lc, 0)),
            scratch_shapes=[pltpu.VMEM((2 * L, HD), jnp.float32)],
        ),
        out_shape=jax.ShapeDtypeStruct((B, L, d_model), jnp.float32),
        compiler_params=pltpu.CompilerParams(
            dimension_semantics=("parallel", "arbitrary")),
    )(delay.astype(jnp.int32), weights.astype(jnp.float32),
      values.astype(jnp.bfloat16), wo.astype(jnp.bfloat16))


# --------------------------------------------------------------------------
# AutoCorrelation self-attention (q = k = v = x, as used by EncoderLayer).
# --------------------------------------------------------------------------
def auto_correlation_self_attention(params, x, attn_mask=None, *, num_heads,
                                    d_keys, d_values, factor=1, block_m=512,
                                    return_attn=True):
    del attn_mask                                      # AutoCorrelation ignores the mask
    B, L, d_model = x.shape
    H = num_heads

    q2, k2, v2 = pallas_qkv(x.reshape(B * L, d_model),
                            params["wq"], params["wk"], params["wv"], block_m=block_m)
    q = q2.reshape(B, L, H, d_keys).astype(jnp.float32)
    k = k2.reshape(B, L, H, d_keys).astype(jnp.float32)

    # TODO(synk): period-based correlation uses rFFT/irFFT which has no Pallas TPU
    # equivalent; it (and lax.top_k) stays in plain XLA.
    q_fft = jnp.fft.rfft(jnp.transpose(q, (0, 2, 3, 1)), axis=-1)
    k_fft = jnp.fft.rfft(jnp.transpose(k, (0, 2, 3, 1)), axis=-1)
    corr = jnp.fft.irfft(q_fft * jnp.conj(k_fft), n=L, axis=-1)       # (B, H, E, L)

    top_k = max(1, int(factor * math.log(L)))
    mean_value = jnp.mean(corr, axis=(1, 2))                          # (B, L)
    weights, delay = jax.lax.top_k(mean_value, top_k)
    tmp_corr = jax.nn.softmax(weights, axis=-1)

    values = v2.reshape(B, L, H * d_values)                           # bf16
    attn_out = time_delay_agg_project(values, delay, tmp_corr, params["wo"])

    attn = jnp.transpose(corr, (0, 3, 1, 2)) if return_attn else None
    return attn_out, attn


# --------------------------------------------------------------------------
# EncoderLayer forward (inference: dropout == identity).
# --------------------------------------------------------------------------
def encoder_layer_forward(params, x, attn_mask=None, *, num_heads, d_keys, d_values,
                          moving_avg=25, activation="relu", factor=1, block_m=512,
                          return_attn=True):
    B, L, d_model = x.shape
    act = jax.nn.relu if activation == "relu" else jax.nn.gelu

    attn_out, attn = auto_correlation_self_attention(
        params, x, attn_mask, num_heads=num_heads, d_keys=d_keys, d_values=d_values,
        factor=factor, block_m=block_m, return_attn=return_attn)

    # decomp1 fused with the first residual add; also emits x = res + attn_out (the
    # second residual) so the add never happens as a standalone XLA op.
    x1_res, x1 = fused_add_decomp(x, attn_out, moving_avg,
                                  output_sum=True, res_dtype=jnp.bfloat16)

    y = pallas_ffn(x1_res.reshape(B * L, d_model), params["w_ff1"], params["w_ff2"],
                   activation=act, block_m=block_m).reshape(B, L, d_model)

    # decomp2 fused with the 'y + res' add; seasonal is the layer output -> f32.
    seasonal = fused_add_decomp(y, x1, moving_avg,
                                output_sum=False, res_dtype=jnp.float32)
    return seasonal, attn


def make_params(key, d_model, num_heads, d_keys, d_values, d_ff):
    ks = jax.random.split(key, 6)

    def init(k, fan_in, shape):
        return jax.random.normal(k, shape, jnp.float32) * (1.0 / math.sqrt(fan_in))

    return dict(
        wq=init(ks[0], d_model, (d_model, d_keys * num_heads)),
        wk=init(ks[1], d_model, (d_model, d_keys * num_heads)),
        wv=init(ks[2], d_model, (d_model, d_values * num_heads)),
        wo=init(ks[3], d_values * num_heads, (d_values * num_heads, d_model)),
        w_ff1=init(ks[4], d_model, (d_model, d_ff)),    # conv1 (1x1, no bias)
        w_ff2=init(ks[5], d_ff, (d_ff, d_model)),       # conv2 (1x1, no bias)
    )


# --------------------------------------------------------------------------
# Pure-JAX reference (same math, precision-matched to the kernels' bf16
# storage/matmul dtypes, no Pallas).
# --------------------------------------------------------------------------
def _mm(a, w):
    return jnp.dot(a.astype(jnp.bfloat16), w.astype(jnp.bfloat16),
                   preferred_element_type=jnp.float32)


def reference_decomp_res(x, kernel_size):
    pad = (kernel_size - 1) // 2
    front = jnp.repeat(x[:, :1, :], pad, axis=1)
    end = jnp.repeat(x[:, -1:, :], pad, axis=1)
    xpad = jnp.concatenate([front, x, end], axis=1)
    L = x.shape[1]
    windows = jnp.stack([xpad[:, i:i + L, :] for i in range(kernel_size)], axis=0)
    return x - jnp.mean(windows, axis=0)


def reference_encoder_layer(params, x, *, num_heads, d_keys, d_values,
                            moving_avg=25, activation="relu", factor=1):
    B, L, d_model = x.shape
    H = num_heads
    act = jax.nn.relu if activation == "relu" else jax.nn.gelu

    res = x
    x2d = x.reshape(B * L, d_model)
    # bf16 storage rounding matches the Pallas QKV kernel outputs.
    q = _mm(x2d, params["wq"]).astype(jnp.bfloat16).reshape(B, L, H, d_keys)
    k = _mm(x2d, params["wk"]).astype(jnp.bfloat16).reshape(B, L, H, d_keys)
    v = _mm(x2d, params["wv"]).astype(jnp.bfloat16).reshape(B, L, H, d_values)

    q_fft = jnp.fft.rfft(jnp.transpose(q.astype(jnp.float32), (0, 2, 3, 1)), axis=-1)
    k_fft = jnp.fft.rfft(jnp.transpose(k.astype(jnp.float32), (0, 2, 3, 1)), axis=-1)
    corr = jnp.fft.irfft(q_fft * jnp.conj(k_fft), n=L, axis=-1)

    top_k = max(1, int(factor * math.log(L)))
    mean_value = jnp.mean(corr, axis=(1, 2))
    weights, delay = jax.lax.top_k(mean_value, top_k)
    tmp_corr = jax.nn.softmax(weights, axis=-1)

    vals = v.reshape(B, L, H * d_values).astype(jnp.float32)
    agg = jnp.zeros_like(vals)
    for i in range(top_k):
        rolled = jax.vmap(lambda vb, db: jnp.roll(vb, -db, axis=0))(vals, delay[:, i])
        agg = agg + rolled * tmp_corr[:, i][:, None, None]
    attn_out = _mm(agg.reshape(B * L, H * d_values), params["wo"]).reshape(B, L, d_model)
    attn = jnp.transpose(corr, (0, 3, 1, 2))

    x1 = res + attn_out
    x1_res = reference_decomp_res(x1, moving_avg)
    h = act(_mm(x1_res.reshape(B * L, d_model), params["w_ff1"]))
    # bf16 storage rounding matches the Pallas FFN kernel output.
    y = _mm(h, params["w_ff2"]).astype(jnp.bfloat16).astype(jnp.float32)
    y = y.reshape(B, L, d_model)
    seasonal = reference_decomp_res(y + x1, moving_avg)
    return seasonal, attn


if __name__ == "__main__":
    B, L = 2, 32
    d_model, H = 32, 4
    d_keys = d_values = d_model // H
    d_ff = 4 * d_model
    moving_avg_k = 25

    root = jax.random.PRNGKey(0)
    kp, kx = jax.random.split(root)
    params = make_params(kp, d_model, H, d_keys, d_values, d_ff)
    x = jax.random.normal(kx, (B, L, d_model), jnp.float32)

    fwd = jax.jit(functools.partial(
        encoder_layer_forward, num_heads=H, d_keys=d_keys, d_values=d_values,
        moving_avg=moving_avg_k, activation="relu"))
    seasonal, attn = fwd(params, x)
    seasonal = jax.block_until_ready(seasonal)
    attn = jax.block_until_ready(attn)

    assert seasonal.shape == (B, L, d_model)
    assert attn.shape == (B, L, H, d_keys)

    seasonal_ref, attn_ref = reference_encoder_layer(
        params, x, num_heads=H, d_keys=d_keys, d_values=d_values,
        moving_avg=moving_avg_k, activation="relu")
    # bf16 matmul inputs / bf16 activation storage (f32 accumulation) on both sides.
    assert jnp.allclose(seasonal, seasonal_ref, rtol=2e-2, atol=2e-2), (
        float(jnp.max(jnp.abs(seasonal - seasonal_ref))))
    assert jnp.allclose(attn, attn_ref, rtol=2e-2, atol=2e-2), (
        float(jnp.max(jnp.abs(attn - attn_ref))))

    print("KERNEL_OK")
</pallas_src>

<mosaic_0001>
module attributes {stable_mosaic.version = 11 : i64} {
  func.func @_qkv_kernel(%arg0: i32, %arg1: memref<64x32xbf16, #tpu.memory_space<vmem>>, %arg2: memref<32x32xbf16, #tpu.memory_space<vmem>>, %arg3: memref<32x32xbf16, #tpu.memory_space<vmem>>, %arg4: memref<32x32xbf16, #tpu.memory_space<vmem>>, %arg5: memref<64x32xbf16, #tpu.memory_space<vmem>>, %arg6: memref<64x32xbf16, #tpu.memory_space<vmem>>, %arg7: memref<64x32xbf16, #tpu.memory_space<vmem>>) attributes {dimension_semantics = [#tpu.dimension_semantics<parallel>], iteration_bounds = array<i64: 1>, scalar_prefetch = 0 : i64, scratch_operands = 0 : i64, tpu.core_type = #tpu.core_type<tc>, window_params = [{transform_indices = @transform_0, window_bounds = array<i64: 64, 32>}, {pipeline_mode = #tpu.pipeline_mode<synchronous>, transform_indices = @transform_1, window_bounds = array<i64: 32, 32>}, {pipeline_mode = #tpu.pipeline_mode<synchronous>, transform_indices = @transform_2, window_bounds = array<i64: 32, 32>}, {pipeline_mode = #tpu.pipeline_mode<synchronous>, transform_indices = @transform_3, window_bounds = array<i64: 32, 32>}, {transform_indices = @transform_4, window_bounds = array<i64: 64, 32>}, {transform_indices = @transform_5, window_bounds = array<i64: 64, 32>}, {transform_indices = @transform_6, window_bounds = array<i64: 64, 32>}]} {
    %c0 = arith.constant 0 : index
    %c0_0 = arith.constant 0 : index
    %0 = vector.load %arg1[%c0, %c0_0] : memref<64x32xbf16, #tpu.memory_space<vmem>>, vector<64x32xbf16>
    %c0_1 = arith.constant 0 : index
    %c0_2 = arith.constant 0 : index
    %1 = vector.load %arg2[%c0_1, %c0_2] : memref<32x32xbf16, #tpu.memory_space<vmem>>, vector<32x32xbf16>
    %cst = arith.constant dense<0.000000e+00> : vector<64x32xf32>
    %2 = tpu.matmul %0, %1, %cst {dimension_numbers = #tpu.dot_dimension_numbers<[1], [0], [0], [1], [0, 0, 1, 1], [], []>} : vector<64x32xbf16>, vector<32x32xbf16>, vector<64x32xf32> -> vector<64x32xf32>
    %3 = arith.truncf %2 : vector<64x32xf32> to vector<64x32xbf16>
    %c0_3 = arith.constant 0 : index
    %c0_4 = arith.constant 0 : index
    %4 = vector.load %arg5[%c0_3, %c0_4] : memref<64x32xbf16, #tpu.memory_space<vmem>>, vector<64x32xbf16>
    tpu.vector_store %arg5[%c0_3, %c0_4], %3 {strides = array<i32>} : memref<64x32xbf16, #tpu.memory_space<vmem>>, vector<64x32xbf16>,
    %c0_5 = arith.constant 0 : index
    %c0_6 = arith.constant 0 : index
    %5 = vector.load %arg3[%c0_5, %c0_6] : memref<32x32xbf16, #tpu.memory_space<vmem>>, vector<32x32xbf16>
    %cst_7 = arith.constant dense<0.000000e+00> : vector<64x32xf32>
    %6 = tpu.matmul %0, %5, %cst_7 {dimension_numbers = #tpu.dot_dimension_numbers<[1], [0], [0], [1], [0, 0, 1, 1], [], []>} : vector<64x32xbf16>, vector<32x32xbf16>, vector<64x32xf32> -> vector<64x32xf32>
    %7 = arith.truncf %6 : vector<64x32xf32> to vector<64x32xbf16>
    %c0_8 = arith.constant 0 : index
    %c0_9 = arith.constant 0 : index
    %8 = vector.load %arg6[%c0_8, %c0_9] : memref<64x32xbf16, #tpu.memory_space<vmem>>, vector<64x32xbf16>
    tpu.vector_store %arg6[%c0_8, %c0_9], %7 {strides = array<i32>} : memref<64x32xbf16, #tpu.memory_space<vmem>>, vector<64x32xbf16>,
    %c0_10 = arith.constant 0 : index
    %c0_11 = arith.constant 0 : index
    %9 = vector.load %arg4[%c0_10, %c0_11] : memref<32x32xbf16, #tpu.memory_space<vmem>>, vector<32x32xbf16>
    %cst_12 = arith.constant dense<0.000000e+00> : vector<64x32xf32>
    %10 = tpu.matmul %0, %9, %cst_12 {dimension_numbers = #tpu.dot_dimension_numbers<[1], [0], [0], [1], [0, 0, 1, 1], [], []>} : vector<64x32xbf16>, vector<32x32xbf16>, vector<64x32xf32> -> vector<64x32xf32>
    %11 = arith.truncf %10 : vector<64x32xf32> to vector<64x32xbf16>
    %c0_13 = arith.constant 0 : index
    %c0_14 = arith.constant 0 : index
    %12 = vector.load %arg7[%c0_13, %c0_14] : memref<64x32xbf16, #tpu.memory_space<vmem>>, vector<64x32xbf16>
    tpu.vector_store %arg7[%c0_13, %c0_14], %11 {strides = array<i32>} : memref<64x32xbf16, #tpu.memory_space<vmem>>, vector<64x32xbf16>,
    return
  }
  func.func @transform_0(%arg0: i32) -> (i32, i32) {
    %c0_i32 = arith.constant 0 : i32
    %c0_i32_0 = arith.constant 0 : i32
    return %arg0, %c0_i32 : i32, i32
  }
  func.func @transform_1(%arg0: i32) -> (i32, i32) {
    %c0_i32 = arith.constant 0 : i32
    %c0_i32_0 = arith.constant 0 : i32
    %c0_i32_1 = arith.constant 0 : i32
    return %c0_i32, %c0_i32_0 : i32, i32
  }
  func.func @transform_2(%arg0: i32) -> (i32, i32) {
    %c0_i32 = arith.constant 0 : i32
    %c0_i32_0 = arith.constant 0 : i32
    %c0_i32_1 = arith.constant 0 : i32
    return %c0_i32, %c0_i32_0 : i32, i32
  }
  func.func @transform_3(%arg0: i32) -> (i32, i32) {
    %c0_i32 = arith.constant 0 : i32
    %c0_i32_0 = arith.constant 0 : i32
    %c0_i32_1 = arith.constant 0 : i32
    return %c0_i32, %c0_i32_0 : i32, i32
  }
  func.func @transform_4(%arg0: i32) -> (i32, i32) {
    %c0_i32 = arith.constant 0 : i32
    %c0_i32_0 = arith.constant 0 : i32
    return %arg0, %c0_i32 : i32, i32
  }
  func.func @transform_5(%arg0: i32) -> (i32, i32) {
    %c0_i32 = arith.constant 0 : i32
    %c0_i32_0 = arith.constant 0 : i32
    return %arg0, %c0_i32 : i32, i32
  }
  func.func @transform_6(%arg0: i32) -> (i32, i32) {
    %c0_i32 = arith.constant 0 : i32
    %c0_i32_0 = arith.constant 0 : i32
    return %arg0, %c0_i32 : i32, i32
  }
}

module attributes {stable_mosaic.version = 11 : i64} {
  func.func @_add_decomp_kernel(%arg0: i32, %arg1: memref<1x32x32xf32, #tpu.memory_space<vmem>>, %arg2: memref<1x32x32xf32, #tpu.memory_space<vmem>>, %arg3: memref<1x32x32xbf16, #tpu.memory_space<vmem>>, %arg4: memref<1x32x32xf32, #tpu.memory_space<vmem>>) attributes {dimension_semantics = [#tpu.dimension_semantics<parallel>], iteration_bounds = array<i64: 2>, scalar_prefetch = 0 : i64, scratch_operands = 0 : i64, tpu.core_type = #tpu.core_type<tc>, window_params = [{transform_indices = @transform_0, window_bounds = array<i64: 1, 32, 32>}, {transform_indices = @transform_1, window_bounds = array<i64: 1, 32, 32>}, {transform_indices = @transform_2, window_bounds = array<i64: 1, 32, 32>}, {transform_indices = @transform_3, window_bounds = array<i64: 1, 32, 32>}]} {
    %c0 = arith.constant 0 : index
    %c0_0 = arith.constant 0 : index
    %c0_1 = arith.constant 0 : index
    %0 = vector.load %arg1[%c0, %c0_0, %c0_1] : memref<1x32x32xf32, #tpu.memory_space<vmem>>, vector<1x32x32xf32>
    %1 = vector.shape_cast %0 : vector<1x32x32xf32> to vector<32x32xf32>
    %c0_2 = arith.constant 0 : index
    %c0_3 = arith.constant 0 : index
    %c0_4 = arith.constant 0 : index
    %2 = vector.load %arg2[%c0_2, %c0_3, %c0_4] : memref<1x32x32xf32, #tpu.memory_space<vmem>>, vector<1x32x32xf32>
    %3 = vector.shape_cast %2 : vector<1x32x32xf32> to vector<32x32xf32>
    %4 = arith.addf %1, %3 : vector<32x32xf32>
    %5 = vector.extract_strided_slice %4 {offsets = [0, 0], sizes = [1, 32], strides = [1, 1]} : vector<32x32xf32> to vector<1x32xf32>
    %6 = vector.shape_cast %5 : vector<1x32xf32> to vector<1x32xf32>
    %7 = vector.broadcast %6 : vector<1x32xf32> to vector<12x32xf32>
    %8 = vector.extract_strided_slice %4 {offsets = [31, 0], sizes = [1, 32], strides = [1, 1]} : vector<32x32xf32> to vector<1x32xf32>
    %9 = vector.shape_cast %8 : vector<1x32xf32> to vector<1x32xf32>
    %10 = vector.broadcast %9 : vector<1x32xf32> to vector<12x32xf32>
    %11 = tpu.concatenate %7, %4, %10 in 0 : vector<12x32xf32>, vector<32x32xf32>, vector<12x32xf32> -> vector<56x32xf32>
    %12 = vector.extract_strided_slice %11 {offsets = [0, 0], sizes = [55, 32], strides = [1, 1]} : vector<56x32xf32> to vector<55x32xf32>
    %13 = vector.extract_strided_slice %11 {offsets = [1, 0], sizes = [55, 32], strides = [1, 1]} : vector<56x32xf32> to vector<55x32xf32>
    %14 = arith.addf %12, %13 : vector<55x32xf32>
    %15 = vector.extract_strided_slice %14 {offsets = [0, 0], sizes = [53, 32], strides = [1, 1]} : vector<55x32xf32> to vector<53x32xf32>
    %16 = vector.extract_strided_slice %14 {offsets = [2, 0], sizes = [53, 32], strides = [1, 1]} : vector<55x32xf32> to vector<53x32xf32>
    %17 = arith.addf %15, %16 : vector<53x32xf32>
    %18 = vector.extract_strided_slice %17 {offsets = [0, 0], sizes = [49, 32], strides = [1, 1]} : vector<53x32xf32> to vector<49x32xf32>
    %19 = vector.extract_strided_slice %17 {offsets = [4, 0], sizes = [49, 32], strides = [1, 1]} : vector<53x32xf32> to vector<49x32xf32>
    %20 = arith.addf %18, %19 : vector<49x32xf32>
    %21 = vector.extract_strided_slice %20 {offsets = [0, 0], sizes = [41, 32], strides = [1, 1]} : vector<49x32xf32> to vector<41x32xf32>
    %22 = vector.extract_strided_slice %20 {offsets = [8, 0], sizes = [41, 32], strides = [1, 1]} : vector<49x32xf32> to vector<41x32xf32>
    %23 = arith.addf %21, %22 : vector<41x32xf32>
    %24 = vector.extract_strided_slice %23 {offsets = [0, 0], sizes = [32, 32], strides = [1, 1]} : vector<41x32xf32> to vector<32x32xf32>
    %25 = vector.extract_strided_slice %20 {offsets = [16, 0], sizes = [32, 32], strides = [1, 1]} : vector<49x32xf32> to vector<32x32xf32>
    %26 = arith.addf %24, %25 : vector<32x32xf32>
    %27 = vector.extract_strided_slice %11 {offsets = [24, 0], sizes = [32, 32], strides = [1, 1]} : vector<56x32xf32> to vector<32x32xf32>
    %28 = arith.addf %26, %27 : vector<32x32xf32>
    %cst = arith.constant 4.000000e-02 : f32
    %29 = vector.broadcast %cst : f32 to vector<32x32xf32>
    %30 = arith.mulf %28, %29 : vector<32x32xf32>
    %31 = arith.subf %4, %30 : vector<32x32xf32>
    %32 = arith.truncf %31 : vector<32x32xf32> to vector<32x32xbf16>
    %c0_5 = arith.constant 0 : index
    %c0_6 = arith.constant 0 : index
    %c0_7 = arith.constant 0 : index
    %33 = vector.load %arg3[%c0_5, %c0_6, %c0_7] : memref<1x32x32xbf16, #tpu.memory_space<vmem>>, vector<1x32x32xbf16>
    %34 = vector.shape_cast %33 : vector<1x32x32xbf16> to vector<32x32xbf16>
    %35 = vector.shape_cast %32 : vector<32x32xbf16> to vector<1x32x32xbf16>
    tpu.vector_store %arg3[%c0_5, %c0_6, %c0_7], %35 {strides = array<i32>} : memref<1x32x32xbf16, #tpu.memory_space<vmem>>, vector<1x32x32xbf16>,
    %c0_8 = arith.constant 0 : index
    %c0_9 = arith.constant 0 : index
    %c0_10 = arith.constant 0 : index
    %36 = vector.load %arg4[%c0_8, %c0_9, %c0_10] : memref<1x32x32xf32, #tpu.memory_space<vmem>>, vector<1x32x32xf32>
    %37 = vector.shape_cast %36 : vector<1x32x32xf32> to vector<32x32xf32>
    %38 = vector.shape_cast %4 : vector<32x32xf32> to vector<1x32x32xf32>
    tpu.vector_store %arg4[%c0_8, %c0_9, %c0_10], %38 {strides = array<i32>} : memref<1x32x32xf32, #tpu.memory_space<vmem>>, vector<1x32x32xf32>,
    return
  }
  func.func @transform_0(%arg0: i32) -> (i32, i32, i32) {
    %c0_i32 = arith.constant 0 : i32
    %c0_i32_0 = arith.constant 0 : i32
    %c0_i32_1 = arith.constant 0 : i32
    return %arg0, %c0_i32, %c0_i32_0 : i32, i32, i32
  }
  func.func @transform_1(%arg0: i32) -> (i32, i32, i32) {
    %c0_i32 = arith.constant 0 : i32
    %c0_i32_0 = arith.constant 0 : i32
    %c0_i32_1 = arith.constant 0 : i32
    return %arg0, %c0_i32, %c0_i32_0 : i32, i32, i32
  }
  func.func @transform_2(%arg0: i32) -> (i32, i32, i32) {
    %c0_i32 = arith.constant 0 : i32
    %c0_i32_0 = arith.constant 0 : i32
    %c0_i32_1 = arith.constant 0 : i32
    return %arg0, %c0_i32, %c0_i32_0 : i32, i32, i32
  }
  func.func @transform_3(%arg0: i32) -> (i32, i32, i32) {
    %c0_i32 = arith.constant 0 : i32
    %c0_i32_0 = arith.constant 0 : i32
    %c0_i32_1 = arith.constant 0 : i32
    return %arg0, %c0_i32, %c0_i32_0 : i32, i32, i32
  }
}

module attributes {stable_mosaic.version = 11 : i64} {
  func.func @_agg_project_kernel(%arg0: i32, %arg1: i32, %arg2: memref<2x3xi32, #tpu.memory_space<smem>>, %arg3: memref<2x3xf32, #tpu.memory_space<smem>>, %arg4: memref<1x32x32xbf16, #tpu.memory_space<vmem>>, %arg5: memref<32x32xbf16, #tpu.memory_space<vmem>>, %arg6: memref<1x32x32xf32, #tpu.memory_space<vmem>>, %arg7: memref<64x32xf32, #tpu.memory_space<vmem>>) attributes {dimension_semantics = [#tpu.dimension_semantics<parallel>, #tpu.dimension_semantics<arbitrary>], iteration_bounds = array<i64: 2, 1>, scalar_prefetch = 2 : i64, scratch_operands = 1 : i64, tpu.core_type = #tpu.core_type<tc>, window_params = [{transform_indices = @transform_0, window_bounds = array<i64: 1, 32, 32>}, {pipeline_mode = #tpu.pipeline_mode<synchronous>, transform_indices = @transform_1, window_bounds = array<i64: 32, 32>}, {transform_indices = @transform_2, window_bounds = array<i64: 1, 32, 32>}]} {
    %c0_i32 = arith.constant 0 : i32
    %0 = arith.cmpi eq, %arg1, %c0_i32 : i32
    %1 = arith.extui %0 : i1 to i32
    %c0_i32_0 = arith.constant 0 : i32
    %2 = arith.cmpi ne, %1, %c0_i32_0 : i32
    scf.if %2 {
      %c0_13 = arith.constant 0 : index
      %c0_14 = arith.constant 0 : index
      %c0_15 = arith.constant 0 : index
      %41 = vector.load %arg4[%c0_13, %c0_14, %c0_15] : memref<1x32x32xbf16, #tpu.memory_space<vmem>>, vector<1x32x32xbf16>
      %42 = vector.shape_cast %41 : vector<1x32x32xbf16> to vector<32x32xbf16>
      %43 = arith.extf %42 : vector<32x32xbf16> to vector<32x32xf32>
      %c0_16 = arith.constant 0 : index
      %c0_17 = arith.constant 0 : index
      %44 = vector.load %arg7[%c0_16, %c0_17] : memref<64x32xf32, #tpu.memory_space<vmem>>, vector<32x32xf32>
      tpu.vector_store %arg7[%c0_16, %c0_17], %43 {strides = array<i32>} : memref<64x32xf32, #tpu.memory_space<vmem>>, vector<32x32xf32>,
      %c32 = arith.constant 32 : index
      %c0_18 = arith.constant 0 : index
      %45 = vector.load %arg7[%c32, %c0_18] : memref<64x32xf32, #tpu.memory_space<vmem>>, vector<32x32xf32>
      tpu.vector_store %arg7[%c32, %c0_18], %43 {strides = array<i32>} : memref<64x32xf32, #tpu.memory_space<vmem>>, vector<32x32xf32>,
    } else {
    }
    %c32_i32 = arith.constant 32 : i32
    %3 = arith.muli %arg1, %c32_i32 : i32
    %cst = arith.constant 0.000000e+00 : f32
    %4 = vector.broadcast %cst : f32 to vector<32x32xf32>
    %5 = arith.index_cast %arg0 : i32 to index
    %c0 = arith.constant 0 : index
    %6 = memref.load %arg2[%5, %c0] : memref<2x3xi32, #tpu.memory_space<smem>>
    %7 = arith.index_cast %arg0 : i32 to index
    %c0_1 = arith.constant 0 : index
    %8 = memref.load %arg3[%7, %c0_1] : memref<2x3xf32, #tpu.memory_space<smem>>
    %9 = arith.addi %3, %6 : i32
    %10 = arith.index_cast %9 : i32 to index
    %c0_2 = arith.constant 0 : index
    %11 = vector.load %arg7[%10, %c0_2] : memref<64x32xf32, #tpu.memory_space<vmem>>, vector<32x32xf32>
    %12 = vector.broadcast %8 : f32 to vector<32x32xf32>
    %13 = arith.mulf %11, %12 : vector<32x32xf32>
    %14 = arith.addf %4, %13 : vector<32x32xf32>
    %15 = arith.index_cast %arg0 : i32 to index
    %c1 = arith.constant 1 : index
    %16 = memref.load %arg2[%15, %c1] : memref<2x3xi32, #tpu.memory_space<smem>>
    %17 = arith.index_cast %arg0 : i32 to index
    %c1_3 = arith.constant 1 : index
    %18 = memref.load %arg3[%17, %c1_3] : memref<2x3xf32, #tpu.memory_space<smem>>
    %19 = arith.addi %3, %16 : i32
    %20 = arith.index_cast %19 : i32 to index
    %c0_4 = arith.constant 0 : index
    %21 = vector.load %arg7[%20, %c0_4] : memref<64x32xf32, #tpu.memory_space<vmem>>, vector<32x32xf32>
    %22 = vector.broadcast %18 : f32 to vector<32x32xf32>
    %23 = arith.mulf %21, %22 : vector<32x32xf32>
    %24 = arith.addf %14, %23 : vector<32x32xf32>
    %25 = arith.index_cast %arg0 : i32 to index
    %c2 = arith.constant 2 : index
    %26 = memref.load %arg2[%25, %c2] : memref<2x3xi32, #tpu.memory_space<smem>>
    %27 = arith.index_cast %arg0 : i32 to index
    %c2_5 = arith.constant 2 : index
    %28 = memref.load %arg3[%27, %c2_5] : memref<2x3xf32, #tpu.memory_space<smem>>
    %29 = arith.addi %3, %26 : i32
    %30 = arith.index_cast %29 : i32 to index
    %c0_6 = arith.constant 0 : index
    %31 = vector.load %arg7[%30, %c0_6] : memref<64x32xf32, #tpu.memory_space<vmem>>, vector<32x32xf32>
    %32 = vector.broadcast %28 : f32 to vector<32x32xf32>
    %33 = arith.mulf %31, %32 : vector<32x32xf32>
    %34 = arith.addf %24, %33 : vector<32x32xf32>
    %35 = arith.truncf %34 : vector<32x32xf32> to vector<32x32xbf16>
    %c0_7 = arith.constant 0 : index
    %c0_8 = arith.constant 0 : index
    %36 = vector.load %arg5[%c0_7, %c0_8] : memref<32x32xbf16, #tpu.memory_space<vmem>>, vector<32x32xbf16>
    %cst_9 = arith.constant dense<0.000000e+00> : vector<32x32xf32>
    %37 = tpu.matmul %35, %36, %cst_9 {dimension_numbers = #tpu.dot_dimension_numbers<[1], [0], [0], [1], [0, 0, 1, 1], [], []>} : vector<32x32xbf16>, vector<32x32xbf16>, vector<32x32xf32> -> vector<32x32xf32>
    %c0_10 = arith.constant 0 : index
    %c0_11 = arith.constant 0 : index
    %c0_12 = arith.constant 0 : index
    %38 = vector.load %arg6[%c0_10, %c0_11, %c0_12] : memref<1x32x32xf32, #tpu.memory_space<vmem>>, vector<1x32x32xf32>
    %39 = vector.shape_cast %38 : vector<1x32x32xf32> to vector<32x32xf32>
    %40 = vector.shape_cast %37 : vector<32x32xf32> to vector<1x32x32xf32>
    tpu.vector_store %arg6[%c0_10, %c0_11, %c0_12], %40 {strides = array<i32>} : memref<1x32x32xf32, #tpu.memory_space<vmem>>, vector<1x32x32xf32>,
    return
  }
  func.func @transform_0(%arg0: i32, %arg1: i32, %arg2: memref<2x3xi32, #tpu.memory_space<smem>>, %arg3: memref<2x3xf32, #tpu.memory_space<smem>>) -> (i32, i32, i32) {
    %c0_i32 = arith.constant 0 : i32
    %c0_i32_0 = arith.constant 0 : i32
    %c0_i32_1 = arith.constant 0 : i32
    return %arg0, %c0_i32, %c0_i32_0 : i32, i32, i32
  }
  func.func @transform_1(%arg0: i32, %arg1: i32, %arg2: memref<2x3xi32, #tpu.memory_space<smem>>, %arg3: memref<2x3xf32, #tpu.memory_space<smem>>) -> (i32, i32) {
    %c0_i32 = arith.constant 0 : i32
    %c0_i32_0 = arith.constant 0 : i32
    %c0_i32_1 = arith.constant 0 : i32
    return %c0_i32, %c0_i32_0 : i32, i32
  }
  func.func @transform_2(%arg0: i32, %arg1: i32, %arg2: memref<2x3xi32, #tpu.memory_space<smem>>, %arg3: memref<2x3xf32, #tpu.memory_space<smem>>) -> (i32, i32, i32) {
    %c0_i32 = arith.constant 0 : i32
    %c0_i32_0 = arith.constant 0 : i32
    return %arg0, %arg1, %c0_i32 : i32, i32, i32
  }
}

module attributes {stable_mosaic.version = 11 : i64} {
  func.func @_ffn_kernel(%arg0: i32, %arg1: memref<64x32xbf16, #tpu.memory_space<vmem>>, %arg2: memref<32x128xbf16, #tpu.memory_space<vmem>>, %arg3: memref<128x32xbf16, #tpu.memory_space<vmem>>, %arg4: memref<64x32xbf16, #tpu.memory_space<vmem>>) attributes {dimension_semantics = [#tpu.dimension_semantics<parallel>], iteration_bounds = array<i64: 1>, scalar_prefetch = 0 : i64, scratch_operands = 0 : i64, tpu.core_type = #tpu.core_type<tc>, window_params = [{transform_indices = @transform_0, window_bounds = array<i64: 64, 32>}, {pipeline_mode = #tpu.pipeline_mode<synchronous>, transform_indices = @transform_1, window_bounds = array<i64: 32, 128>}, {pipeline_mode = #tpu.pipeline_mode<synchronous>, transform_indices = @transform_2, window_bounds = array<i64: 128, 32>}, {transform_indices = @transform_3, window_bounds = array<i64: 64, 32>}]} {
    %c0 = arith.constant 0 : index
    %c0_0 = arith.constant 0 : index
    %0 = vector.load %arg1[%c0, %c0_0] : memref<64x32xbf16, #tpu.memory_space<vmem>>, vector<64x32xbf16>
    %c0_1 = arith.constant 0 : index
    %c0_2 = arith.constant 0 : index
    %1 = vector.load %arg2[%c0_1, %c0_2] : memref<32x128xbf16, #tpu.memory_space<vmem>>, vector<32x128xbf16>
    %cst = arith.constant dense<0.000000e+00> : vector<64x128xf32>
    %2 = tpu.matmul %0, %1, %cst {dimension_numbers = #tpu.dot_dimension_numbers<[1], [0], [0], [1], [0, 0, 1, 1], [], []>} : vector<64x32xbf16>, vector<32x128xbf16>, vector<64x128xf32> -> vector<64x128xf32>
    %cst_3 = arith.constant 0.000000e+00 : f32
    %3 = vector.broadcast %cst_3 : f32 to vector<64x128xf32>
    %4 = arith.maximumf %2, %3 : vector<64x128xf32>
    %5 = arith.truncf %4 : vector<64x128xf32> to vector<64x128xbf16>
    %c0_4 = arith.constant 0 : index
    %c0_5 = arith.constant 0 : index
    %6 = vector.load %arg3[%c0_4, %c0_5] : memref<128x32xbf16, #tpu.memory_space<vmem>>, vector<128x32xbf16>
    %cst_6 = arith.constant dense<0.000000e+00> : vector<64x32xf32>
    %7 = tpu.matmul %5, %6, %cst_6 {dimension_numbers = #tpu.dot_dimension_numbers<[1], [0], [0], [1], [0, 0, 1, 1], [], []>} : vector<64x128xbf16>, vector<128x32xbf16>, vector<64x32xf32> -> vector<64x32xf32>
    %8 = arith.truncf %7 : vector<64x32xf32> to vector<64x32xbf16>
    %c0_7 = arith.constant 0 : index
    %c0_8 = arith.constant 0 : index
    %9 = vector.load %arg4[%c0_7, %c0_8] : memref<64x32xbf16, #tpu.memory_space<vmem>>, vector<64x32xbf16>
    tpu.vector_store %arg4[%c0_7, %c0_8], %8 {strides = array<i32>} : memref<64x32xbf16, #tpu.memory_space<vmem>>, vector<64x32xbf16>,
    return
  }
  func.func @transform_0(%arg0: i32) -> (i32, i32) {
    %c0_i32 = arith.constant 0 : i32
    %c0_i32_0 = arith.constant 0 : i32
    return %arg0, %c0_i32 : i32, i32
  }
  func.func @transform_1(%arg0: i32) -> (i32, i32) {
    %c0_i32 = arith.constant 0 : i32
    %c0_i32_0 = arith.constant 0 : i32
    %c0_i32_1 = arith.constant 0 : i32
    return %c0_i32, %c0_i32_0 : i32, i32
  }
  func.func @transform_2(%arg0: i32) -> (i32, i32) {
    %c0_i32 = arith.constant 0 : i32
    %c0_i32_0 = arith.constant 0 : i32
    %c0_i32_1 = arith.constant 0 : i32
    return %c0_i32, %c0_i32_0 : i32, i32
  }
  func.func @transform_3(%arg0: i32) -> (i32, i32) {
    %c0_i32 = arith.constant 0 : i32
    %c0_i32_0 = arith.constant 0 : i32
    return %arg0, %c0_i32 : i32, i32
  }
}

module attributes {stable_mosaic.version = 11 : i64} {
  func.func @_add_decomp_kernel(%arg0: i32, %arg1: memref<1x32x32xbf16, #tpu.memory_space<vmem>>, %arg2: memref<1x32x32xf32, #tpu.memory_space<vmem>>, %arg3: memref<1x32x32xf32, #tpu.memory_space<vmem>>) attributes {dimension_semantics = [#tpu.dimension_semantics<parallel>], iteration_bounds = array<i64: 2>, scalar_prefetch = 0 : i64, scratch_operands = 0 : i64, tpu.core_type = #tpu.core_type<tc>, window_params = [{transform_indices = @transform_0, window_bounds = array<i64: 1, 32, 32>}, {transform_indices = @transform_1, window_bounds = array<i64: 1, 32, 32>}, {transform_indices = @transform_2, window_bounds = array<i64: 1, 32, 32>}]} {
    %c0 = arith.constant 0 : index
    %c0_0 = arith.constant 0 : index
    %c0_1 = arith.constant 0 : index
    %0 = vector.load %arg1[%c0, %c0_0, %c0_1] : memref<1x32x32xbf16, #tpu.memory_space<vmem>>, vector<1x32x32xbf16>
    %1 = vector.shape_cast %0 : vector<1x32x32xbf16> to vector<32x32xbf16>
    %2 = arith.extf %1 : vector<32x32xbf16> to vector<32x32xf32>
    %c0_2 = arith.constant 0 : index
    %c0_3 = arith.constant 0 : index
    %c0_4 = arith.constant 0 : index
    %3 = vector.load %arg2[%c0_2, %c0_3, %c0_4] : memref<1x32x32xf32, #tpu.memory_space<vmem>>, vector<1x32x32xf32>
    %4 = vector.shape_cast %3 : vector<1x32x32xf32> to vector<32x32xf32>
    %5 = arith.addf %2, %4 : vector<32x32xf32>
    %6 = vector.extract_strided_slice %5 {offsets = [0, 0], sizes = [1, 32], strides = [1, 1]} : vector<32x32xf32> to vector<1x32xf32>
    %7 = vector.shape_cast %6 : vector<1x32xf32> to vector<1x32xf32>
    %8 = vector.broadcast %7 : vector<1x32xf32> to vector<12x32xf32>
    %9 = vector.extract_strided_slice %5 {offsets = [31, 0], sizes = [1, 32], strides = [1, 1]} : vector<32x32xf32> to vector<1x32xf32>
    %10 = vector.shape_cast %9 : vector<1x32xf32> to vector<1x32xf32>
    %11 = vector.broadcast %10 : vector<1x32xf32> to vector<12x32xf32>
    %12 = tpu.concatenate %8, %5, %11 in 0 : vector<12x32xf32>, vector<32x32xf32>, vector<12x32xf32> -> vector<56x32xf32>
    %13 = vector.extract_strided_slice %12 {offsets = [0, 0], sizes = [55, 32], strides = [1, 1]} : vector<56x32xf32> to vector<55x32xf32>
    %14 = vector.extract_strided_slice %12 {offsets = [1, 0], sizes = [55, 32], strides = [1, 1]} : vector<56x32xf32> to vector<55x32xf32>
    %15 = arith.addf %13, %14 : vector<55x32xf32>
    %16 = vector.extract_strided_slice %15 {offsets = [0, 0], sizes = [53, 32], strides = [1, 1]} : vector<55x32xf32> to vector<53x32xf32>
    %17 = vector.extract_strided_slice %15 {offsets = [2, 0], sizes = [53, 32], strides = [1, 1]} : vector<55x32xf32> to vector<53x32xf32>
    %18 = arith.addf %16, %17 : vector<53x32xf32>
    %19 = vector.extract_strided_slice %18 {offsets = [0, 0], sizes = [49, 32], strides = [1, 1]} : vector<53x32xf32> to vector<49x32xf32>
    %20 = vector.extract_strided_slice %18 {offsets = [4, 0], sizes = [49, 32], strides = [1, 1]} : vector<53x32xf32> to vector<49x32xf32>
    %21 = arith.addf %19, %20 : vector<49x32xf32>
    %22 = vector.extract_strided_slice %21 {offsets = [0, 0], sizes = [41, 32], strides = [1, 1]} : vector<49x32xf32> to vector<41x32xf32>
    %23 = vector.extract_strided_slice %21 {offsets = [8, 0], sizes = [41, 32], strides = [1, 1]} : vector<49x32xf32> to vector<41x32xf32>
    %24 = arith.addf %22, %23 : vector<41x32xf32>
    %25 = vector.extract_strided_slice %24 {offsets = [0, 0], sizes = [32, 32], strides = [1, 1]} : vector<41x32xf32> to vector<32x32xf32>
    %26 = vector.extract_strided_slice %21 {offsets = [16, 0], sizes = [32, 32], strides = [1, 1]} : vector<49x32xf32> to vector<32x32xf32>
    %27 = arith.addf %25, %26 : vector<32x32xf32>
    %28 = vector.extract_strided_slice %12 {offsets = [24, 0], sizes = [32, 32], strides = [1, 1]} : vector<56x32xf32> to vector<32x32xf32>
    %29 = arith.addf %27, %28 : vector<32x32xf32>
    %cst = arith.constant 4.000000e-02 : f32
    %30 = vector.broadcast %cst : f32 to vector<32x32xf32>
    %31 = arith.mulf %29, %30 : vector<32x32xf32>
    %32 = arith.subf %5, %31 : vector<32x32xf32>
    %c0_5 = arith.constant 0 : index
    %c0_6 = arith.constant 0 : index
    %c0_7 = arith.constant 0 : index
    %33 = vector.load %arg3[%c0_5, %c0_6, %c0_7] : memref<1x32x32xf32, #tpu.memory_space<vmem>>, vector<1x32x32xf32>
    %34 = vector.shape_cast %33 : vector<1x32x32xf32> to vector<32x32xf32>
    %35 = vector.shape_cast %32 : vector<32x32xf32> to vector<1x32x32xf32>
    tpu.vector_store %arg3[%c0_5, %c0_6, %c0_7], %35 {strides = array<i32>} : memref<1x32x32xf32, #tpu.memory_space<vmem>>, vector<1x32x32xf32>,
    return
  }
  func.func @transform_0(%arg0: i32) -> (i32, i32, i32) {
    %c0_i32 = arith.constant 0 : i32
    %c0_i32_0 = arith.constant 0 : i32
    %c0_i32_1 = arith.constant 0 : i32
    return %arg0, %c0_i32, %c0_i32_0 : i32, i32, i32
  }
  func.func @transform_1(%arg0: i32) -> (i32, i32, i32) {
    %c0_i32 = arith.constant 0 : i32
    %c0_i32_0 = arith.constant 0 : i32
    %c0_i32_1 = arith.constant 0 : i32
    return %arg0, %c0_i32, %c0_i32_0 : i32, i32, i32
  }
  func.func @transform_2(%arg0: i32) -> (i32, i32, i32) {
    %c0_i32 = arith.constant 0 : i32
    %c0_i32_0 = arith.constant 0 : i32
    %c0_i32_1 = arith.constant 0 : i32
    return %arg0, %c0_i32, %c0_i32_0 : i32, i32, i32
  }
}

</mosaic_0001>

<bundles_post_ra>
// kernel: reverse.0
= control target key start
LH: loop header
LB: loop body
LE: loop exit
PB: predicated region body
PF: predicated region fallthrough
CT: control target
= control target key end

     0   :  { %v2_v0 = vlaneseq  ;;  %s238_s0 = inlined_call_operand.vmem [shape: f32[2,4,8,15], index: 0, kind: input, shape index: {}]   ;;  %s239_s1 = inlined_call_operand.vmem [shape: f32[2,4,8,15], index: 1, kind: output, shape index: {}]  }
   0x1   :  { %v50_v2 = vld [vmem:[%s238_s0 + $0x10] sm:$0xff]  ;;  %v46_v3 = vld [vmem:[%s238_s0] sm:$0xff]  ;;  %v52_v4 = vld [vmem:[%s238_s0 + $0x18] sm:$0xff] }
   0x2   :  { %v3_v1 = vsub.s32 14, %v2_v0  ;;  %v48_v5 = vld [vmem:[%s238_s0 + $0x8] sm:$0xff]  ;;  %v54_v7 = vld [vmem:[%s238_s0 + $0x20] sm:$0xff]  ;;  %v60_v8 = vld [vmem:[%s238_s0 + $0x38] sm:$0xff] }
   0x3   :  { %v56_v6 = vld [vmem:[%s238_s0 + $0x28] sm:$0xff]  ;;  %v58_v9 = vld [vmem:[%s238_s0 + $0x30] sm:$0xff] }
   0x4   :  { %4 = vset.pattern.permute.xlu0 %v3_v1  ;;  %179 = vset.pattern.permute.xlu1 %v3_v1 }
   0x5   :  { %78 = vperm.xlu1 %179, %v50_v2   ;;  %66 = vperm.xlu0 %4, %v46_v3  }
   0x9   :  { %84 = vperm.xlu1 %179, %v52_v4   ;;  %72 = vperm.xlu0 %4, %v48_v5  }
   0xd   :  { %96 = vperm.xlu1 %179, %v56_v6   ;;  %90 = vperm.xlu0 %4, %v54_v7  }
  0x11   :  { %108 = vperm.xlu1 %179, %v60_v8   ;;  %102 = vperm.xlu0 %4, %v58_v9  }
  0x84   :  { %v79_v10 = vpop.permute.xlu1 %78  ;;  %v67_v11 = vpop.permute.xlu0 %66 }
  0x85   :  { %157 = vst [vmem:[%s239_s1 + $0x10] sm:$0xff] %v79_v10  ;;  %153 = vst [vmem:[%s239_s1] sm:$0xff] %v67_v11 }
  0x88   :  { %v85_v12 = vpop.permute.xlu1 %84  ;;  %v73_v13 = vpop.permute.xlu0 %72 }
  0x89   :  { %159 = vst [vmem:[%s239_s1 + $0x18] sm:$0xff] %v85_v12  ;;  %155 = vst [vmem:[%s239_s1 + $0x8] sm:$0xff] %v73_v13 }
  0x8c   :  { %v97_v14 = vpop.permute.xlu1 %96  ;;  %v91_v15 = vpop.permute.xlu0 %90 }
  0x8d   :  { %163 = vst [vmem:[%s239_s1 + $0x28] sm:$0xff] %v97_v14  ;;  %161 = vst [vmem:[%s239_s1 + $0x20] sm:$0xff] %v91_v15 }
  0x90   :  { %v109_v16 = vpop.permute.xlu1 %108  ;;  %v103_v17 = vpop.permute.xlu0 %102 }
  0x91   :  { %167 = vst [vmem:[%s239_s1 + $0x38] sm:$0xff] %v109_v16  ;;  %165 = vst [vmem:[%s239_s1 + $0x30] sm:$0xff] %v103_v17 }

// kernel: encoder_layer_forward.5
= control target key start
LH: loop header
LB: loop body
LE: loop exit
PB: predicated region body
PF: predicated region fallthrough
CT: control target
= control target key end

     0   :  { %12 = vsyncpa [#allocation3], 0  ;;  %s1050_s0 = inlined_call_operand.hbm [shape: bf16[64,32], index: 0, kind: input, shape index: {}]   ;;  %s1051_s1 = inlined_call_operand.hbm [shape: bf16[32,32], index: 1, kind: input, shape index: {}]   ;;  %s1052_s2 = inlined_call_operand.hbm [shape: bf16[32,32], index: 2, kind: input, shape index: {}]   ;;  %s1053_s3 = inlined_call_operand.hbm [shape: bf16[32,32], index: 3, kind: input, shape index: {}]   ;;  %s1054_s4 = inlined_call_operand.hbm [shape: bf16[64,32], index: 4, kind: output, shape index: {0}]   ;;  %s1055_s5 = inlined_call_operand.hbm [shape: bf16[64,32], index: 5, kind: output, shape index: {1}]   ;;  %s1056_s6 = inlined_call_operand.hbm [shape: bf16[64,32], index: 6, kind: output, shape index: {2}]  }
   0x1   :  { %13 = vsyncpa [#allocation6], 0 }
   0x2   :  { %14 = vsyncpa [#allocation9], 0 }
   0x3   :  { %15 = vsyncpa [#allocation4], 0 }
   0x4   :  { %16 = vsyncpa [#allocation12], 0  ;;  %s844_s21 = smov [#allocation5]   ;;  %s845_s23 = smov [#allocation2]  }
   0x5   :  { %s34_s22 = sshll.u32 %s844_s21, 4  ;;  %s22_s24 = sshll.u32 %s845_s23, 4  ;;  %s35_s22 = int_to_ptr.vmem [resolvable:$true] %s34_s22  ;;  %s888_s24 = int_to_ptr.vmem [resolvable:$true] %s22_s24 }
   0x6   :  { %s680_s27 = scalar_lea.hbm %s1051_s1, 256 }
   0x7   :  { %p681_p0 = scmp.ne.s32.totalorder %s1051_s1, %s680_s27  ;;  %p684_p1 = scmp.lt.u32.totalorder %s680_s27, %s1051_s1 }
   0x9   :  { %p686_p2 = pnand %p684_p1, %p681_p0 }
   0xb   :  { %689 = shalt.err (!%p686_p2)
}
   0xc   :  { %s690_s8 = scalar_lea.vmem %s35_s22, 256  ;;  %p695_p4 = scmp.lt.s32.totalorder %s35_s22, %s35_s22 }
   0xd   :  { %p691_p3 = scmp.ne.s32.totalorder %s35_s22, %s690_s8  ;;  %p696_p5 = scmp.lt.s32.totalorder %s690_s8, %s690_s8 }
   0xf   :  { %p697_p6 = por %p696_p5, %p695_p4 }
  0x11   :  { %p698_p7 = pnand %p697_p6, %p691_p3 }
  0x13   :  { %701 = shalt.err (!%p698_p7)
}
  0x14   :  { %s846_s9 = smov 64   ;;  %s847_s10 = smov 4  }
  0x15   :  { %40 = dma.hbm_to_vmem [thread:$0]  %s1051_s1, 256, %s35_s22, [#allocation6], %s846_s9, %s846_s9, %s847_s10  }
  0x16   :  { %s702_s15 = scalar_lea.hbm %s1050_s0, 512 }
  0x17   :  { %p703_p8 = scmp.ne.s32.totalorder %s1050_s0, %s702_s15  ;;  %p706_p9 = scmp.lt.u32.totalorder %s702_s15, %s1050_s0 }
  0x19   :  { %p708_p10 = pnand %p706_p9, %p703_p8 }
  0x1b   :  { %711 = shalt.err (!%p708_p10)
}
  0x1c   :  { %s712_s20 = scalar_lea.vmem %s888_s24, 512  ;;  %p717_p12 = scmp.lt.s32.totalorder %s888_s24, %s888_s24 }
  0x1d   :  { %p713_p11 = scmp.ne.s32.totalorder %s888_s24, %s712_s20  ;;  %p718_p13 = scmp.lt.s32.totalorder %s712_s20, %s712_s20 }
  0x1f   :  { %p719_p0 = por %p718_p13, %p717_p12 }
  0x21   :  { %p720_p1 = pnand %p719_p0, %p713_p11 }
  0x23   :  { %723 = shalt.err (!%p720_p1)
}
  0x24   :  { %28 = dma.hbm_to_vmem [thread:$0]  %s1050_s0, 512, %s888_s24, [#allocation3], %s846_s9, %s846_s9, %s847_s10  }
  0x25   :  { %s848_s22 = smov [#allocation7]   ;;  %s849_s25 = smov [#allocation8]  }
  0x26   :  { %s46_s23 = sshll.u32 %s848_s22, 4  ;;  %s58_s26 = sshll.u32 %s849_s25, 4  ;;  %s47_s23 = int_to_ptr.vmem [resolvable:$true] %s46_s23  ;;  %s925_s26 = int_to_ptr.vmem [resolvable:$true] %s58_s26 }
  0x27   :  { %s724_s29 = scalar_lea.hbm %s1052_s2, 256 }
  0x28   :  { %p725_p2 = scmp.ne.s32.totalorder %s1052_s2, %s724_s29  ;;  %p728_p3 = scmp.lt.u32.totalorder %s724_s29, %s1052_s2 }
  0x2a   :  { %p730_p4 = pnand %p728_p3, %p725_p2 }
  0x2c   :  { %733 = shalt.err (!%p730_p4)
}
  0x2d   :  { %s734_s0 = scalar_lea.vmem %s47_s23, 256  ;;  %p739_p6 = scmp.lt.s32.totalorder %s47_s23, %s47_s23 }
  0x2e   :  { %p735_p5 = scmp.ne.s32.totalorder %s47_s23, %s734_s0  ;;  %p740_p7 = scmp.lt.s32.totalorder %s734_s0, %s734_s0 }
  0x30   :  { %p741_p8 = por %p740_p7, %p739_p6 }
  0x32   :  { %p742_p9 = pnand %p741_p8, %p735_p5 }
  0x34   :  { %745 = shalt.err (!%p742_p9)
}
  0x35   :  { %52 = dma.hbm_to_vmem [thread:$0]  %s1052_s2, 256, %s47_s23, [#allocation6], %s846_s9, %s846_s9, %s847_s10  }
  0x36   :  { %s746_s15 = scalar_lea.hbm %s1053_s3, 256 }
  0x37   :  { %p747_p10 = scmp.ne.s32.totalorder %s1053_s3, %s746_s15  ;;  %p750_p11 = scmp.lt.u32.totalorder %s746_s15, %s1053_s3 }
  0x39   :  { %p752_p12 = pnand %p750_p11, %p747_p10 }
  0x3b   :  { %755 = shalt.err (!%p752_p12)
}
  0x3c   :  { %s756_s20 = scalar_lea.vmem %s925_s26, 256  ;;  %p761_p0 = scmp.lt.s32.totalorder %s925_s26, %s925_s26 }
  0x3d   :  { %p757_p13 = scmp.ne.s32.totalorder %s925_s26, %s756_s20  ;;  %p762_p1 = scmp.lt.s32.totalorder %s756_s20, %s756_s20 }
  0x3f   :  { %p763_p2 = por %p762_p1, %p761_p0 }
  0x41   :  { %p764_p3 = pnand %p763_p2, %p757_p13 }
  0x43   :  { %767 = shalt.err (!%p764_p3)
}
  0x44   :  { %64 = dma.hbm_to_vmem [thread:$0]  %s1053_s3, 256, %s925_s26, [#allocation9], %s846_s9, %s846_s9, %s847_s10  }
  0x45   :  { %834 = dma.done.wait [#allocation3], 512  }
  0x46   :  { %835 = vsyncadd [#allocation3], 4294966784 }
  0x47   :  { %836 = dma.done.wait [#allocation6], 512  }
  0x48   :  { %837 = vsyncadd [#allocation6], 4294966784 }
  0x49   :  { %838 = dma.done.wait [#allocation9], 256  }
  0x4a   :  { %839 = vsyncadd [#allocation9], 4294967040  ;;  %v670_v0 = vld [vmem:[#allocation5] sm:$0xff]   ;;  %v671_v1 = vld [vmem:[#allocation5 + $0x8] sm:$0xff]   ;;  %vm122_vm0 = vcmask 261120   ;;  %vm232_vm1 = vcmask 257024  }
  0x4b   :  { %621 = vmatprep.subr.bf16.mxu0 %v670_v0  ;;  %657 = vmatprep.subr.bf16.mxu1 %v670_v0  ;;  %v672_v2 = vld [vmem:[#allocation2] sm:$0xff]   ;;  %v673_v3 = vld [vmem:[#allocation2 + $0x10] sm:$0xff]   ;;  %v674_v4 = vld [vmem:[#allocation2 + $0x8] sm:$0xff]   ;;  %s850_s3 = smov [#allocation10]  }
  0x4c   :  { %622 = vmatpush3.bf16.msra.mxu0 %v670_v0  ;;  %659 = vmatpush3.bf16.msra.mxu1 %v670_v0  ;;  %v675_v5 = vld [vmem:[#allocation2 + $0x18] sm:$0xff]   ;;  %v676_v6 = vld [vmem:[#allocation7] sm:$0xff]   ;;  %v677_v7 = vld [vmem:[#allocation8] sm:$0xff]   ;;  %s488_s21 = sshll.u32 %s850_s3, 4  ;;  %s489_s21 = int_to_ptr.vmem [resolvable:$true] %s488_s21 }
  0x4d   :  { %623 = vmatprep.subr.bf16.mxu0 %v671_v1  ;;  %658 = vmatprep.subr.bf16.mxu1 %v671_v1  ;;  %v678_v8 = vld [vmem:[#allocation7 + $0x8] sm:$0xff]   ;;  %v679_v9 = vld [vmem:[#allocation8 + $0x8] sm:$0xff]   ;;  %s768_s22 = scalar_lea.vmem %s489_s21, 512  ;;  %p773_p5 = scmp.lt.s32.totalorder %s489_s21, %s489_s21 }
  0x4e   :  { %625 = vmatprep.mubr.msk.bf16.mxu0 %vm122_vm0, %v672_v2  ;;  %629 = vmatprep.mubr.msk.bf16.mxu1 %vm122_vm0, %v673_v3  ;;  %p769_p4 = scmp.ne.s32.totalorder %s489_s21, %s768_s22  ;;  %p774_p6 = scmp.lt.s32.totalorder %s768_s22, %s768_s22 }
  0x50   :  { %624 = vmatpush3.bf16.msra.mxu0 %v671_v1  ;;  %660 = vmatpush3.bf16.msra.mxu1 %v671_v1  ;;  %p775_p7 = por %p774_p6, %p773_p5 }
  0x51   :  { %633 = vmatprep.subr.bf16.mxu1 %v676_v6  ;;  %645 = vmatprep.subr.bf16.mxu0 %v677_v7 }
  0x52   :  { %p776_p8 = pnand %p775_p7, %p769_p4 }
  0x53   :  { %626 = vmatmul.mubr.msk.bf16.vlgmr.msra.gmra.mrb[0].mxu0 %vm122_vm0, %v674_v4  ;;  %630 = vmatmul.mubr.msk.bf16.vlgmr.msra.gmra.mrb[0].mxu1 %vm122_vm0, %v675_v5 }
  0x54   :  { %634 = vmatpush3.bf16.msra.mxu1 %v676_v6  ;;  %646 = vmatpush3.bf16.msra.mxu0 %v677_v7 }
  0x55   :  { %635 = vmatprep.subr.bf16.mxu1 %v678_v8  ;;  %647 = vmatprep.subr.bf16.mxu0 %v679_v9 }
  0x56   :  { %637 = vmatprep.mubr.msk.bf16.mxu1 %vm122_vm0, %v672_v2  ;;  %649 = vmatprep.mubr.msk.bf16.mxu0 %vm122_vm0, %v672_v2 }
  0x58   :  { %636 = vmatpush3.bf16.msra.mxu1 %v678_v8  ;;  %648 = vmatpush3.bf16.msra.mxu0 %v679_v9 }
  0x5b   :  { %638 = vmatmul.mubr.msk.bf16.vlgmr.msra.gmra.mrb[4].mxu1 %vm122_vm0, %v674_v4  ;;  %650 = vmatmul.mubr.msk.bf16.vlgmr.msra.gmra.mrb[4].mxu0 %vm122_vm0, %v674_v4 }
  0x5c   :  { %641 = vmatprep.mubr.msk.bf16.mxu1 %vm122_vm0, %v673_v3  ;;  %653 = vmatprep.mubr.msk.bf16.mxu0 %vm122_vm0, %v673_v3 }
  0x63   :  { %642 = vmatmul.mubr.msk.bf16.gmra.mrb[8].mxu1 %vm122_vm0, %v675_v5  ;;  %654 = vmatmul.mubr.msk.bf16.gmra.mrb[8].mxu0 %vm122_vm0, %v675_v5 }
 0x126   :  { %v627_v10 = vpop.f32.mrb[0].mxu0  ;;  %v631_v11 = vpop.f32.mrb[0].mxu1 }
 0x127   :  { %v581_v12 = vpack.c.bf16 %v627_v10, %v627_v10  ;;  %v585_v13 = vpack.c.bf16 %v631_v11, %v631_v11  ;;  %v169_v14 = vpop.f32.mrb[1].mxu0  ;;  %v185_v15 = vpop.f32.mrb[1].mxu1 }
 0x128   :  { %v579_v16 = vpack.c.bf16 %v169_v14, %v169_v14  ;;  %v583_v17 = vpack.c.bf16 %v185_v15, %v185_v15  ;;  %v628_v18 = vpop.f32.mrb[2].mxu0  ;;  %v632_v19 = vpop.f32.mrb[2].mxu1 }
 0x129   :  { %235 = vst.msk [vmem:[#allocation10 + $0x8] sm:$0xf] %vm232_vm1, %v581_v12  ;;  %239 = vst.msk [vmem:[#allocation10 + $0x18] sm:$0xf] %vm232_vm1, %v585_v13  ;;  %v582_v20 = vpack.c.bf16 %v628_v18, %v628_v18  ;;  %v586_v21 = vpack.c.bf16 %v632_v19, %v632_v19  ;;  %v172_v22 = vpop.f32.mrb[3].mxu0  ;;  %v188_v23 = vpop.f32.mrb[3].mxu1 }
 0x12a   :  { %233 = vst.msk [vmem:[#allocation10] sm:$0xf] %vm232_vm1, %v579_v16  ;;  %237 = vst.msk [vmem:[#allocation10 + $0x10] sm:$0xf] %vm232_vm1, %v583_v17  ;;  %v580_v24 = vpack.c.bf16 %v172_v22, %v172_v22  ;;  %v584_v25 = vpack.c.bf16 %v188_v23, %v188_v23 }
 0x12b   :  { %236 = vst.msk [vmem:[#allocation10 + $0xc] sm:$0xf] %vm232_vm1, %v582_v20  ;;  %240 = vst.msk [vmem:[#allocation10 + $0x1c] sm:$0xf] %vm232_vm1, %v586_v21 }
 0x12c   :  { %234 = vst.msk [vmem:[#allocation10 + $0x4] sm:$0xf] %vm232_vm1, %v580_v24  ;;  %238 = vst.msk [vmem:[#allocation10 + $0x14] sm:$0xf] %vm232_vm1, %v584_v25 }
 0x12d   :  { %779 = shalt.err (!%p776_p8)
}
 0x12e   :  { %s780_s26 = scalar_lea.hbm %s1054_s4, 512 }
 0x12f   :  { %p781_p9 = scmp.ne.s32.totalorder %s1054_s4, %s780_s26  ;;  %p784_p10 = scmp.lt.u32.totalorder %s780_s26, %s1054_s4 }
 0x131   :  { %p786_p11 = pnand %p784_p10, %p781_p9 }
 0x133   :  { %789 = shalt.err (!%p786_p11)
}
 0x134   :  { %494 = dma.vmem_to_hbm [thread:$0]  %s489_s21, 512, %s1054_s4, [#allocation4], %s846_s9, %s846_s9, %s847_s10   ;;  %v639_v26 = vpop.f32.mrb[4].mxu1  ;;  %v651_v27 = vpop.f32.mrb[4].mxu0 }
 0x135   :  { %v589_v28 = vpack.c.bf16 %v639_v26, %v639_v26  ;;  %v597_v29 = vpack.c.bf16 %v651_v27, %v651_v27  ;;  %v291_v30 = vpop.f32.mrb[5].mxu1  ;;  %v412_v31 = vpop.f32.mrb[5].mxu0  ;;  %s851_s4 = smov [#allocation11]   ;;  %s852_s0 = smov [#allocation13]  }
 0x136   :  { %v587_v32 = vpack.c.bf16 %v291_v30, %v291_v30  ;;  %v595_v33 = vpack.c.bf16 %v412_v31, %v412_v31  ;;  %v640_v34 = vpop.f32.mrb[6].mxu1  ;;  %v652_v35 = vpop.f32.mrb[6].mxu0  ;;  %s500_s11 = sshll.u32 %s851_s4, 4  ;;  %s512_s24 = sshll.u32 %s852_s0, 4  ;;  %s501_s11 = int_to_ptr.vmem [resolvable:$true] %s500_s11  ;;  %s1011_s24 = int_to_ptr.vmem [resolvable:$true] %s512_s24 }
 0x137   :  { %356 = vst.msk [vmem:[#allocation11 + $0x8] sm:$0xf] %vm232_vm1, %v589_v28  ;;  %477 = vst.msk [vmem:[#allocation13 + $0x8] sm:$0xf] %vm232_vm1, %v597_v29  ;;  %v590_v36 = vpack.c.bf16 %v640_v34, %v640_v34  ;;  %v598_v37 = vpack.c.bf16 %v652_v35, %v652_v35  ;;  %v294_v38 = vpop.f32.mrb[7].mxu1  ;;  %v415_v39 = vpop.f32.mrb[7].mxu0  ;;  %p795_p13 = scmp.lt.s32.totalorder %s501_s11, %s501_s11 }
 0x138   :  { %354 = vst.msk [vmem:[#allocation11] sm:$0xf] %vm232_vm1, %v587_v32  ;;  %475 = vst.msk [vmem:[#allocation13] sm:$0xf] %vm232_vm1, %v595_v33  ;;  %v588_v40 = vpack.c.bf16 %v294_v38, %v294_v38  ;;  %v596_v41 = vpack.c.bf16 %v415_v39, %v415_v39  ;;  %v643_v42 = vpop.f32.mrb[8].mxu1  ;;  %v655_v43 = vpop.f32.mrb[8].mxu0 }
 0x139   :  { %357 = vst.msk [vmem:[#allocation11 + $0xc] sm:$0xf] %vm232_vm1, %v590_v36  ;;  %478 = vst.msk [vmem:[#allocation13 + $0xc] sm:$0xf] %vm232_vm1, %v598_v37  ;;  %v593_v44 = vpack.c.bf16 %v643_v42, %v643_v42  ;;  %v601_v45 = vpack.c.bf16 %v655_v43, %v655_v43  ;;  %v307_v46 = vpop.f32.mrb[9].mxu1  ;;  %v428_v47 = vpop.f32.mrb[9].mxu0 }
 0x13a   :  { %355 = vst.msk [vmem:[#allocation11 + $0x4] sm:$0xf] %vm232_vm1, %v588_v40  ;;  %476 = vst.msk [vmem:[#allocation13 + $0x4] sm:$0xf] %vm232_vm1, %v596_v41  ;;  %v591_v48 = vpack.c.bf16 %v307_v46, %v307_v46  ;;  %v599_v49 = vpack.c.bf16 %v428_v47, %v428_v47  ;;  %v644_v50 = vpop.f32.mrb[10].mxu1  ;;  %v656_v51 = vpop.f32.mrb[10].mxu0 }
 0x13b   :  { %360 = vst.msk [vmem:[#allocation11 + $0x18] sm:$0xf] %vm232_vm1, %v593_v44  ;;  %481 = vst.msk [vmem:[#allocation13 + $0x18] sm:$0xf] %vm232_vm1, %v601_v45  ;;  %v594_v52 = vpack.c.bf16 %v644_v50, %v644_v50  ;;  %v602_v53 = vpack.c.bf16 %v656_v51, %v656_v51  ;;  %v310_v54 = vpop.f32.mrb[11].mxu1  ;;  %v431_v55 = vpop.f32.mrb[11].mxu0 }
 0x13c   :  { %358 = vst.msk [vmem:[#allocation11 + $0x10] sm:$0xf] %vm232_vm1, %v591_v48  ;;  %479 = vst.msk [vmem:[#allocation13 + $0x10] sm:$0xf] %vm232_vm1, %v599_v49  ;;  %v592_v56 = vpack.c.bf16 %v310_v54, %v310_v54  ;;  %v600_v57 = vpack.c.bf16 %v431_v55, %v431_v55  ;;  %s790_s12 = scalar_lea.vmem %s501_s11, 512 }
 0x13d   :  { %361 = vst.msk [vmem:[#allocation11 + $0x1c] sm:$0xf] %vm232_vm1, %v594_v52  ;;  %482 = vst.msk [vmem:[#allocation13 + $0x1c] sm:$0xf] %vm232_vm1, %v602_v53  ;;  %p791_p12 = scmp.ne.s32.totalorder %s501_s11, %s790_s12  ;;  %p796_p0 = scmp.lt.s32.totalorder %s790_s12, %s790_s12 }
 0x13e   :  { %359 = vst.msk [vmem:[#allocation11 + $0x14] sm:$0xf] %vm232_vm1, %v592_v56  ;;  %480 = vst.msk [vmem:[#allocation13 + $0x14] sm:$0xf] %vm232_vm1, %v600_v57 }
 0x13f   :  { %p797_p1 = por %p796_p0, %p795_p13 }
 0x141   :  { %p798_p2 = pnand %p797_p1, %p791_p12 }
 0x143   :  { %801 = shalt.err (!%p798_p2)
}
 0x144   :  { %s802_s15 = scalar_lea.hbm %s1055_s5, 512 }
 0x145   :  { %p803_p3 = scmp.ne.s32.totalorder %s1055_s5, %s802_s15  ;;  %p806_p4 = scmp.lt.u32.totalorder %s802_s15, %s1055_s5 }
 0x147   :  { %p808_p5 = pnand %p806_p4, %p803_p3 }
 0x149   :  { %811 = shalt.err (!%p808_p5)
}
 0x14a   :  { %506 = dma.vmem_to_hbm [thread:$0]  %s501_s11, 512, %s1055_s5, [#allocation12], %s846_s9, %s846_s9, %s847_s10  }
 0x14b   :  { %s812_s1 = scalar_lea.vmem %s1011_s24, 512  ;;  %p817_p7 = scmp.lt.s32.totalorder %s1011_s24, %s1011_s24 }
 0x14c   :  { %p813_p6 = scmp.ne.s32.totalorder %s1011_s24, %s812_s1  ;;  %p818_p8 = scmp.lt.s32.totalorder %s812_s1, %s812_s1 }
 0x14e   :  { %p819_p9 = por %p818_p8, %p817_p7 }
 0x150   :  { %p820_p10 = pnand %p819_p9, %p813_p6 }
 0x152   :  { %823 = shalt.err (!%p820_p10)
}
 0x153   :  { %s824_s22 = scalar_lea.hbm %s1056_s6, 512 }
 0x154   :  { %p825_p11 = scmp.ne.s32.totalorder %s1056_s6, %s824_s22  ;;  %p828_p12 = scmp.lt.u32.totalorder %s824_s22, %s1056_s6 }
 0x156   :  { %p830_p13 = pnand %p828_p12, %p825_p11 }
 0x158   :  { %833 = shalt.err (!%p830_p13)
}
 0x159   :  { %518 = dma.vmem_to_hbm [thread:$0]  %s1011_s24, 512, %s1056_s6, [#allocation12], %s846_s9, %s846_s9, %s847_s10  }
 0x15a   :  { %840 = dma.done.wait [#allocation4], 512  }
 0x15b   :  { %841 = vsyncadd [#allocation4], 4294966784 }
 0x15c   :  { %842 = dma.done.wait [#allocation12], 1024  }
 0x15d   :  { %843 = vsyncadd [#allocation12], 4294966272 }
 0x15e   :  { %528 = vsyncpa [#allocation3], 1 }
 0x15f   :  { %529 = vsyncpa [#allocation6], 1 }
 0x160   :  { %530 = vsyncpa [#allocation9], 1 }
 0x161   :  { %531 = vsyncpa [#allocation4], 1 }
 0x162   :  { %532 = vsyncpa [#allocation12], 1 }

// kernel: encoder_layer_forward.7
= control target key start
LH: loop header
LB: loop body
LE: loop exit
PB: predicated region body
PF: predicated region fallthrough
CT: control target
= control target key end

     0   :  { %9 = vsyncpa [#allocation3], 0  ;;  %s941_s0 = inlined_call_operand.vmem [shape: f32[2,32,32], index: 0, kind: input, shape index: {}]   ;;  %s942_s1 = inlined_call_operand.vmem [shape: f32[2,32,32], index: 1, kind: input, shape index: {}]   ;;  %s943_s2 = inlined_call_operand.hbm [shape: bf16[2,32,32], index: 2, kind: output, shape index: {0}]   ;;  %s944_s3 = inlined_call_operand.hbm [shape: f32[2,32,32], index: 3, kind: output, shape index: {1}]  }
   0x1   :  { %11 = vsyncpa [#allocation3 + $0x1], 0 }
   0x2   :  { %12 = vsyncpa [#allocation5], 0 }
   0x3   :  { %14 = vsyncpa [#allocation5 + $0x1], 0  ;;  %s725_s12 = smov 0   ;;  %s727_s13 = smov 0  }
   0x4   :  { %s729_s14 = smov 0   ;;  %s731_s15 = smov 0  }
   0x5 LB: > { %s746_s16 = sadd.s32 4294967295, %s697_s15   ;;  %s525_s17 = sadd.s32 4294967294, %s697_s15   ;;  %s697_s15 = sphi %s731_s15, %s950_s15   ;;  %s693_s14 = sphi %s729_s14, %s949_s14   ;;  %s689_s13 = sphi %s727_s13, %s948_s13   ;;  %s685_s12 = sphi %s725_s12, %s947_s12  }
   0x6   : > { %s750_s18 = sadd.s32 1, %s697_s15   ;;  %s79_s19 = sadd.s32 1, %s693_s14 }
   0x7   : > { %s76_s20 = ssub.s32 %s697_s15, %s750_s18  ;;  %p89_p0 = scmp.ne.s32.totalorder %s693_s14, %s689_s13 }
   0x8   : > { %p77_p1 = scmp.eq.s32.totalorder %s76_s20, 0  ;;  %p90_p2 = scmp.eq.s32.totalorder %s746_s16, 1 }
   0x9   : > { %p95_p3 = scmp.ne.s32.totalorder %s689_s13, %s685_s12  ;;  %p96_p4 = scmp.eq.s32.totalorder %s525_s17, 1 }
   0xa   : > { %s761_s21 = scalar_select %p77_p1, %s693_s14, %s79_s19  }
   0xb   : > { %p763_p5 = por %p90_p2, %p89_p0  ;;  %p767_p6 = por %p96_p4, %p95_p3 }
   0xc   : > { %p528_p7 = scmp.ge.s32.totalorder %s697_s15, 1  ;;  %p156_p8 = scmp.lt.s32.totalorder %s697_s15, 3 }
   0xe   : > { %p157_p9 = pnand %p528_p7, %p156_p8 }
   0xf   : > { %p190_p10 = scmp.lt.s32.totalorder (!%p157_p9), %s746_s16, 1  ;;  %v212_v0 = vlaneseq (!%p157_p9)  ;;  %s775_s24 = sand.u32 (!%p157_p9), 1, %s689_s13   ;;  %vm379_vm0 = vcmask (!%p157_p9), 261120   ;;  %vm225_vm1 = vcmask (!%p157_p9), 1043456   ;;  %vm243_vm2 = vcmask (!%p157_p9), 1046528  }
  0x10   : > { %160 = sbr.rel (%p157_p9) target bundleno = 94 (0x5e), region = 28  ;;  %s530_s26 = sshll.u32 (!%p157_p9), %s775_s24, 5 }
  0x11   : > { %v213_v1 = vshrl.u32 (!%p157_p9), %v212_v0, 7  ;;  %s189_s7 = scalar_lea.vmem (!%p157_p9), [#allocation4], %s530_s26  ;;  %s554_s9 = sshll.u32 (!%p157_p9), %s746_s16, 9 }
  0x12   : > { %s419_s8 = sshll.u32 (!%p157_p9), %s189_s7, 4  ;;  %s806_s17 = scalar_lea.hbm (!%p157_p9), %s944_s3, %s554_s9  ;;  %s793_s8 = int_to_ptr.vmem [resolvable:$true] %s419_s8 }
  0x13   : > { %v214_v5 = vsub.s32 (!%p157_p9), 0, %v213_v1  ;;  %v218_v9 = vsub.s32 (!%p157_p9), 7, %v213_v1  ;;  %s390_s19 = scalar_lea.sflag (!%p157_p9), [#allocation5], %s775_s24  ;;  %s603_s20 = scalar_lea.vmem (!%p157_p9), %s793_s8, 512 }
  0x14   : > { %p604_p11 = scmp.ne.s32.totalorder (!%p157_p9), %s793_s8, %s603_s20 }
  0x16   : > { %p605_p12 = pnand (!%p157_p9), %p604_p11, %p763_p5 }
  0x17   : > { %s191_s25 = scalar_select %p190_p10, %s746_s16, 1 }
  0x18   : > { %p606_p13 = pneg %p605_p12 }
  0x19   : > { %s547_s27 = sshll.u32 %s191_s25, 5  ;;  %s699_s25 = smov [#allocation4]  }
  0x1a   : > { %s194_s30 = scalar_lea.vmem %s941_s0, %s547_s27  ;;  %s199_s6 = scalar_lea.vmem %s942_s1, %s547_s27 }
  0x1b   : > { %v200_v2 = vld [vmem:[%s194_s30] sm:$0xff]  ;;  %v201_v3 = vld [vmem:[%s194_s30 + $0x8] sm:$0xff]  ;;  %v202_v4 = vld [vmem:[%s194_s30 + $0x10] sm:$0xff]  ;;  %s607_s26 = sshll.u32 %s699_s25, 4  ;;  %s608_s26 = int_to_ptr.vmem [resolvable:$false] %s607_s26 }
  0x1c   : > { %v203_v6 = vld [vmem:[%s194_s30 + $0x18] sm:$0xff]  ;;  %v204_v7 = vld [vmem:[%s199_s6] sm:$0xff]  ;;  %v205_v8 = vld [vmem:[%s199_s6 + $0x8] sm:$0xff]  ;;  %s609_s27 = scalar_lea.vmem %s608_s26, 1024  ;;  %p610_p0 = scmp.lt.s32.totalorder %s793_s8, %s608_s26 }
  0x1d   : > { %v206_v10 = vld [vmem:[%s199_s6 + $0x10] sm:$0xff]  ;;  %v207_v11 = vld [vmem:[%s199_s6 + $0x18] sm:$0xff]  ;;  %v785_v12 = vadd.f32 %v204_v7, %v200_v2  ;;  %v787_v13 = vadd.f32 %v205_v8, %v201_v3  ;;  %p611_p1 = scmp.lt.s32.totalorder %s609_s27, %s603_s20 }
  0x1e   : > { %v789_v14 = vadd.f32 %v206_v10, %v202_v4  ;;  %v791_v15 = vadd.f32 %v207_v11, %v203_v6 }
  0x1f   : > { %v215_v16 = vrot.slane %v785_v12, %v214_v5  ;;  %v226_v17 = vrot.slane %v785_v12, 4  ;;  %v227_v18 = vrot.slane %v787_v13, 4  ;;  %380 = vst.msk [vmem:[%s189_s7] sm:$0xff] %vm379_vm0, %v785_v12  ;;  %381 = vst.msk [vmem:[%s189_s7 + $0x8] sm:$0xff] %vm379_vm0, %v787_v13  ;;  %p612_p2 = por %p611_p1, %p610_p0 }
  0x20   : > { %v809_v19 = vrot.slane %v791_v15, %v218_v9  ;;  %v229_v20 = vrot.slane %v789_v14, 4  ;;  %v231_v21 = vrot.slane %v791_v15, 4  ;;  %382 = vst.msk [vmem:[%s189_s7 + $0x10] sm:$0xff] %vm379_vm0, %v789_v14  ;;  %383 = vst.msk [vmem:[%s189_s7 + $0x18] sm:$0xff] %vm379_vm0, %v791_v15 }
  0x21   : > { %v228_v22 = vsel %vm225_vm1, %v226_v17, %v227_v18  ;;  %v239_v23 = vsel %vm225_vm1, %v215_v16, %v226_v17  ;;  %v244_v24 = vrot.slane %v215_v16, 1  ;;  %p613_p3 = pnand %p612_p2, %p606_p13 }
  0x23   : > { %616 = shalt.err (!%p613_p3)
}
  0x24   : > { %s617_s28 = scalar_lea.hbm %s806_s17, 512  ;;  %s621_s4 = scalar_lea.hbm %s944_s3, 1024 }
  0x25   : > { %p618_p4 = scmp.ne.s32.totalorder %s806_s17, %s617_s28  ;;  %p622_p9 = scmp.lt.u32.totalorder %s806_s17, %s944_s3 }
  0x26   : > { %p623_p10 = scmp.lt.u32.totalorder %s621_s4, %s617_s28  ;;  %p625_p12 = scmp.lt.u32.totalorder %s617_s28, %s806_s17 }
  0x27   : > { %p619_p7 = pnand %p618_p4, %p763_p5 }
  0x28   : > { %p624_p11 = por %p623_p10, %p622_p9 }
  0x29   : > { %p620_p8 = pneg %p619_p7 }
  0x2a   : > { %p626_p13 = por %p625_p12, %p624_p11 }
  0x2c   : > { %p627_p0 = pnand %p626_p13, %p620_p8 }
  0x2e   : > { %630 = shalt.err (!%p627_p0)
}
  0x2f   : > { %s700_s7 = smov 128   ;;  %s701_s9 = smov 8   ;;  %v844_v25 = vsel %vm225_vm1, %v227_v18, %v229_v20  ;;  %v847_v26 = vsel %vm225_vm1, %v229_v20, %v231_v21  ;;  %v851_v27 = vsel %vm225_vm1, %v231_v21, %v809_v19  ;;  %v245_v28 = vrot.slane %v239_v23, 1 }
  0x30   : > { %556 = dma.vmem_to_hbm [thread:$0]  (%p763_p5), %s793_s8, 512, %s806_s17, %s390_s19, %s700_s7, %s700_s7, %s701_s9   ;;  %v247_v29 = vrot.slane %v228_v22, 1  ;;  %v249_v30 = vrot.slane %v844_v25, 1  ;;  %v251_v31 = vrot.slane %v847_v26, 1  ;;  %v253_v32 = vrot.slane %v851_v27, 1 }
  0x31   : > { %v246_v33 = vsel %vm243_vm2, %v244_v24, %v245_v28  ;;  %v255_v34 = vrot.slane %v809_v19, 1  ;;  %vm278_vm3 = vcmask 1045504   ;;  %s529_s8 = sshll.u32 %s775_s24, 4  ;;  %vm374_vm4 = vcmask 257024   ;;  %s553_s17 = sshll.u32 %s746_s16, 8 }
  0x32   : > { %v248_v35 = vsel %vm243_vm2, %v245_v28, %v247_v29  ;;  %v250_v36 = vsel %vm243_vm2, %v247_v29, %v249_v30  ;;  %v252_v37 = vsel %vm243_vm2, %v249_v30, %v251_v31  ;;  %v254_v38 = vsel %vm243_vm2, %v251_v31, %v253_v32  ;;  %s182_s10 = scalar_lea.vmem [#allocation2], %s529_s8  ;;  %s895_s25 = scalar_lea.hbm %s943_s2, %s553_s17 }
  0x33   : > { %v264_v39 = vadd.f32 %v246_v33, %v215_v16  ;;  %v265_v40 = vadd.f32 %v248_v35, %v239_v23  ;;  %v266_v41 = vadd.f32 %v250_v36, %v228_v22  ;;  %v267_v42 = vadd.f32 %v252_v37, %v844_v25  ;;  %s403_s11 = sshll.u32 %s182_s10, 4  ;;  %s385_s16 = scalar_lea.sflag [#allocation3], %s775_s24  ;;  %s890_s11 = int_to_ptr.vmem [resolvable:$true] %s403_s11 }
  0x34   : > { %v268_v43 = vadd.f32 %v254_v38, %v847_v26  ;;  %v256_v44 = vsel %vm243_vm2, %v253_v32, %v255_v34  ;;  %v270_v45 = vadd.f32 %v255_v34, %v809_v19  ;;  %s631_s26 = scalar_lea.vmem %s890_s11, 256  ;;  %s702_s27 = smov [#allocation2]  }
  0x35   : > { %v279_v46 = vrot.slane %v264_v39, 2  ;;  %v280_v47 = vrot.slane %v265_v40, 2  ;;  %v282_v48 = vrot.slane %v266_v41, 2  ;;  %v284_v49 = vrot.slane %v267_v42, 2  ;;  %p632_p1 = scmp.ne.s32.totalorder %s890_s11, %s631_s26  ;;  %s635_s28 = sshll.u32 %s702_s27, 4  ;;  %s636_s28 = int_to_ptr.vmem [resolvable:$false] %s635_s28 }
  0x36   : > { %v286_v50 = vrot.slane %v268_v43, 2  ;;  %v269_v51 = vadd.f32 %v256_v44, %v851_v27  ;;  %v290_v55 = vrot.slane %v270_v45, 2  ;;  %s637_s29 = scalar_lea.vmem %s636_s28, 512  ;;  %p638_p4 = scmp.lt.s32.totalorder %s890_s11, %s636_s28 }
  0x37   : > { %v281_v52 = vsel %vm278_vm3, %v279_v46, %v280_v47  ;;  %v283_v53 = vsel %vm278_vm3, %v280_v47, %v282_v48  ;;  %v285_v54 = vsel %vm278_vm3, %v282_v48, %v284_v49  ;;  %p633_p2 = pnand %p632_p1, %p763_p5  ;;  %p639_p7 = scmp.lt.s32.totalorder %s637_s29, %s631_s26 }
  0x38   : > { %v287_v56 = vsel %vm278_vm3, %v284_v49, %v286_v50  ;;  %v299_v57 = vadd.f32 %v281_v52, %v264_v39  ;;  %v300_v58 = vadd.f32 %v283_v53, %v265_v40  ;;  %v301_v59 = vadd.f32 %v285_v54, %v266_v41 }
  0x39   : > { %v302_v60 = vadd.f32 %v287_v56, %v267_v42  ;;  %v288_v61 = vrot.slane %v269_v51, 2  ;;  %v305_v62 = vadd.f32 %v290_v55, %v270_v45  ;;  %p634_p3 = pneg %p633_p2  ;;  %p640_p8 = por %p639_p7, %p638_p4 }
  0x3a   : > { %v313_v63 = vrot.slane %v299_v57, 4  ;;  %v314_v0 = vrot.slane %v300_v58, 4  ;;  %v316_v1 = vrot.slane %v301_v59, 4 }
  0x3b   : > { %v318_v2 = vrot.slane %v302_v60, 4  ;;  %v289_v3 = vsel %vm278_vm3, %v286_v50, %v288_v61  ;;  %v291_v4 = vsel %vm278_vm3, %v288_v61, %v290_v55  ;;  %v324_v5 = vrot.slane %v305_v62, 4  ;;  %p641_p9 = pnand %p640_p8, %p634_p3 }
  0x3c   : > { %v315_v6 = vsel %vm225_vm1, %v313_v63, %v314_v0  ;;  %v317_v7 = vsel %vm225_vm1, %v314_v0, %v316_v1  ;;  %v303_v8 = vadd.f32 %v289_v3, %v268_v43  ;;  %v304_v9 = vadd.f32 %v291_v4, %v269_v51 }
  0x3d   : > { %v319_v10 = vsel %vm225_vm1, %v316_v1, %v318_v2  ;;  %v332_v11 = vadd.f32 %v315_v6, %v299_v57  ;;  %v333_v16 = vadd.f32 %v317_v7, %v300_v58 }
  0x3e   : > { %v334_v17 = vadd.f32 %v319_v10, %v301_v59  ;;  %v320_v18 = vrot.slane %v303_v8, 4  ;;  %v322_v20 = vrot.slane %v304_v9, 4 }
  0x3f   : > { %v338_v21 = vadd.f32 %v333_v16, %v332_v11 }
  0x40   : > { %v321_v22 = vsel %vm225_vm1, %v318_v2, %v320_v18  ;;  %v339_v23 = vadd.f32 %v334_v17, %v333_v16  ;;  %v323_v24 = vsel %vm225_vm1, %v320_v18, %v322_v20  ;;  %v325_v28 = vsel %vm225_vm1, %v322_v20, %v324_v5 }
  0x41   : > { %v342_v29 = vadd.f32 %v338_v21, %v334_v17  ;;  %v335_v30 = vadd.f32 %v321_v22, %v302_v60  ;;  %v336_v31 = vadd.f32 %v323_v24, %v303_v8  ;;  %v337_v32 = vadd.f32 %v325_v28, %v304_v9 }
  0x43   : > { %v346_v33 = vadd.f32 %v342_v29, %v844_v25  ;;  %v343_v34 = vadd.f32 %v339_v23, %v335_v30  ;;  %v340_v35 = vadd.f32 %v335_v30, %v334_v17  ;;  %v341_v36 = vadd.f32 %v336_v31, %v335_v30 }
  0x45   : > { %v350_v37 = vmul.f32 0.04, %v346_v33  ;;  %v347_v38 = vadd.f32 %v343_v34, %v847_v26  ;;  %v344_v39 = vadd.f32 %v340_v35, %v336_v31  ;;  %v345_v40 = vadd.f32 %v341_v36, %v337_v32 }
  0x47   : > { %v354_v41 = vsub.f32 %v785_v12, %v350_v37  ;;  %v351_v42 = vmul.f32 0.04, %v347_v38  ;;  %v348_v43 = vadd.f32 %v344_v39, %v851_v27  ;;  %v349_v44 = vadd.f32 %v345_v40, %v809_v19 }
  0x49   : > { %v549_v45 = vpack.c.bf16 %v354_v41, %v354_v41  ;;  %v355_v25 = vsub.f32 %v787_v13, %v351_v42  ;;  %v352_v46 = vmul.f32 0.04, %v348_v43  ;;  %v353_v47 = vmul.f32 0.04, %v349_v44 }
  0x4b   : > { %375 = vst.msk [vmem:[%s182_s10] sm:$0xf] %vm374_vm4, %v549_v45  ;;  %v550_v26 = vpack.c.bf16 %v355_v25, %v355_v25  ;;  %v356_v12 = vsub.f32 %v789_v14, %v352_v46  ;;  %v357_v27 = vsub.f32 %v791_v15, %v353_v47 }
  0x4d   : > { %376 = vst.msk [vmem:[%s182_s10 + $0x4] sm:$0xf] %vm374_vm4, %v550_v26  ;;  %v551_v13 = vpack.c.bf16 %v356_v12, %v356_v12  ;;  %v552_v19 = vpack.c.bf16 %v357_v27, %v357_v27 }
  0x4f   : > { %377 = vst.msk [vmem:[%s182_s10 + $0x8] sm:$0xf] %vm374_vm4, %v551_v13  ;;  %378 = vst.msk [vmem:[%s182_s10 + $0xc] sm:$0xf] %vm374_vm4, %v552_v19 }
  0x50   : > { %644 = shalt.err (!%p641_p9)
}
  0x51   : > { %s645_s30 = scalar_lea.hbm %s895_s25, 256  ;;  %s649_s6 = scalar_lea.hbm %s943_s2, 512 }
  0x52   : > { %p646_p10 = scmp.ne.s32.totalorder %s895_s25, %s645_s30  ;;  %p650_p13 = scmp.lt.u32.totalorder %s895_s25, %s943_s2 }
  0x53   : > { %p651_p0 = scmp.lt.u32.totalorder %s649_s6, %s645_s30  ;;  %p653_p2 = scmp.lt.u32.totalorder %s645_s30, %s895_s25 }
  0x54   : > { %p647_p11 = pnand %p646_p10, %p763_p5 }
  0x55   : > { %p652_p1 = por %p651_p0, %p650_p13 }
  0x56   : > { %p648_p12 = pneg %p647_p11 }
  0x57   : > { %p654_p3 = por %p653_p2, %p652_p1 }
  0x59   : > { %p655_p4 = pnand %p654_p3, %p648_p12 }
  0x5b   : > { %658 = shalt.err (!%p655_p4)
}
  0x5c   : > { %s703_s8 = smov 64   ;;  %s704_s10 = smov 4  }
  0x5d   : > { %555 = dma.vmem_to_hbm [thread:$0]  (%p763_p5), %s890_s11, 256, %s895_s25, %s385_s16, %s703_s8, %s703_s8, %s704_s10  }
  0x5e PF: > { %p566_p7 = scmp.ge.s32.totalorder %s697_s15, 2  ;;  %s434_s17 = sand.u32 1, %s685_s12  }
  0x5f   : > { %s435_s19 = scalar_lea.sflag [#allocation3], %s434_s17 }
  0x60   : > { %p560_p8 = pnand %p566_p7, %p767_p6 }
  0x62   : > { %676 = dma.done.wait (!%p560_p8), %s435_s19, 256  }
  0x63   : > { %678 = vsyncadd (!%p560_p8), %s435_s19, 4294967040  ;;  %s444_s20 = scalar_lea.sflag [#allocation5], %s434_s17 }
  0x64   : > { %680 = dma.done.wait (!%p560_p8), %s444_s20, 512  }
  0x65   : > { %682 = vsyncadd (!%p560_p8), %s444_s20, 4294966784  ;;  %p17_p5 = scmp.ge.s32.totalorder %s750_s18, 4   ;;  %s947_s12 = smov %s689_s13 }
  0x66   : > { %s948_s13 = smov %s693_s14  ;;  %s949_s14 = smov %s761_s21 }
  0x67   : > { %s950_s15 = smov %s750_s18  ;;  %19 = sbr.rel (!%p17_p5) target bundleno = 5 (0x5), region = 83 }
  0x6e   :  { %449 = vsyncpa [#allocation3], 1 }
  0x6f   :  { %451 = vsyncpa [#allocation3 + $0x1], 1 }
  0x70   :  { %452 = vsyncpa [#allocation5], 1 }
  0x71   :  { %454 = vsyncpa [#allocation5 + $0x1], 1 }

// kernel: encoder_layer_forward.6
= control target key start
LH: loop header
LB: loop body
LE: loop exit
PB: predicated region body
PF: predicated region fallthrough
CT: control target
= control target key end

     0   :  { %s631_s0 = inlined_call_operand.vmem [shape: s32[2,3], index: 0, kind: input, shape index: {}]   ;;  %s632_s2 = inlined_call_operand.vmem [shape: bf16[2,32,32], index: 2, kind: input, shape index: {}]   ;;  %s633_s3 = inlined_call_operand.vmem [shape: bf16[32,32], index: 3, kind: input, shape index: {}]   ;;  %s634_s4 = inlined_call_operand.vmem [shape: f32[2,32,32], index: 4, kind: output, shape index: {}]   ;;  %s635_s1 = inlined_call_operand.vmem [shape: f32[2,3], index: 1, kind: input, shape index: {}]  }
   0x1   :  { %s9_s17 = sshll.u32 %s631_s0, 4  ;;  %s13_s20 = sshll.u32 %s635_s1, 4  ;;  %s10_s17 = int_to_ptr.vmem [resolvable:$true] %s9_s17  ;;  %s14_s20 = int_to_ptr.vmem [resolvable:$true] %s13_s20 }
   0x2   :  { %s491_s21 = scalar_lea.vmem %s10_s17, 32  ;;  %p496_p1 = scmp.lt.s32.totalorder %s10_s17, %s10_s17 }
   0x3   :  { %p492_p0 = scmp.ne.s32.totalorder %s10_s17, %s491_s21  ;;  %p497_p2 = scmp.lt.s32.totalorder %s491_s21, %s491_s21 }
   0x5   :  { %p498_p3 = por %p497_p2, %p496_p1 }
   0x7   :  { %p499_p4 = pnand %p498_p3, %p492_p0 }
   0x9   :  { %502 = shalt.err (!%p499_p4)  }
   0xa   :  { %s541_s22 = smov [#allocation4]   ;;  %s503_s23 = scalar_lea.vmem %s14_s20, 32 }
   0xb   :  { %12 = dma.vmem_to_smem %s10_s17, 32, %s541_s22, [#allocation3] }
   0xc   :  { %p504_p5 = scmp.ne.s32.totalorder %s14_s20, %s503_s23  ;;  %p508_p6 = scmp.lt.s32.totalorder %s14_s20, %s14_s20 }
   0xd   :  { %p509_p7 = scmp.lt.s32.totalorder %s503_s23, %s503_s23 }
   0xf   :  { %p510_p8 = por %p509_p7, %p508_p6 }
  0x11   :  { %p511_p9 = pnand %p510_p8, %p504_p5 }
  0x13   :  { %514 = shalt.err (!%p511_p9)  }
  0x14   :  { %s542_s0 = smov [#allocation5]  }
  0x15   :  { %16 = dma.vmem_to_smem %s14_s20, 32, %s542_s0, [#allocation3] }
  0x16   :  { %527 = dma.done.wait [#allocation3], 64 }
  0x17   :  { %528 = vsyncadd [#allocation3], 4294967232 }
  0x18   :  { %18 = sfence }
  0x19   :  { %s574_s1 = smov 0   ;;  %s576_s24 = smov 0  }
  0x1a   :  { %s578_s25 = smov 0  }
  0x1b LB: > { %s36_s26 = sadd.s32 1, %s535_s24  ;;  %p428_p10 = scmp.ge.s32.totalorder %s539_s25, 1  ;;  %s539_s25 = sphi %s578_s25, %s24_s25   ;;  %s535_s24 = sphi %s576_s24, %s637_s24   ;;  %s531_s1 = sphi %s574_s1, %s636_s1  }
  0x1c   : > { %p38_p11 = scmp.ge.s32.totalorder %s36_s26, 2  ;;  %p138_p12 = scmp.lt.s32.totalorder %s539_s25, 3 }
  0x1e   : > { %s639_s26 = smov (%p38_p11, %s36_s26), 0  ;;  %p139_p13 = pnand %p428_p10, %p138_p12 }
  0x1f   : > { %v489_v0 = vld [vmem:[%s633_s3] sm:$0xff] (!%p139_p13)   ;;  %p164_p0 = scmp.lt.s32.totalorder (!%p139_p13), %s531_s1, 1  ;;  %v490_v1 = vld [vmem:[%s633_s3 + $0x8] sm:$0xff] (!%p139_p13)   ;;  %s433_s6 = sshll.u32 (!%p139_p13), %s531_s1, 7  ;;  %vm192_vm0 = vcmask (!%p139_p13), 261120  }
  0x20   : > { %142 = sbr.rel (%p139_p13) target bundleno = 284 (0x11c), region = 28  ;;  %455 = vmatprep.subr.bf16.mxu0 (!%p139_p13), %v489_v0  ;;  %s203_s8 = sld [smem:[#allocation4 + %s433_s6]] (!%p139_p13) }
  0x21   : > { %456 = vmatpush3.bf16.msra.mxu0 (!%p139_p13), %v489_v0  ;;  %s204_s12 = sld [smem:[#allocation5 + %s433_s6]] (!%p139_p13)  ;;  %s220_s13 = sadd.s32 (!%p139_p13), 1, %s433_s6 }
  0x22   : > { %457 = vmatprep.subr.bf16.mxu0 (!%p139_p13), %v490_v1  ;;  %s238_s14 = sadd.s32 (!%p139_p13), 2, %s433_s6  ;;  %s221_s15 = sld [smem:[#allocation4 + %s220_s13]] (!%p139_p13) }
  0x23   : > { %s222_s16 = sld [smem:[#allocation5 + %s220_s13]] (!%p139_p13) }
  0x24   : > { %s239_s17 = sld [smem:[#allocation4 + %s238_s14]] (!%p139_p13) }
  0x25   : > { %458 = vmatpush3.bf16.msra.mxu0 (!%p139_p13), %v490_v1  ;;  %s240_s18 = sld [smem:[#allocation5 + %s238_s14]] (!%p139_p13) }
  0x26   : > { %s206_s19 = scalar_lea.vmem (!%p139_p13), [#allocation2], %s203_s8 }
  0x27   : > { %s598_s5 = scalar_select %p164_p0, %s531_s1, 1  ;;  %v211_v8 = vstv %s204_s12 }
  0x28   : > { %s224_s20 = scalar_lea.vmem [#allocation2], %s221_s15 }
  0x29   : > { %s440_s7 = sshll.u32 %s598_s5, 4  ;;  %v229_v9 = vstv %s222_s16  ;;  %s441_s22 = sshll.u32 %s598_s5, 5 }
  0x2a   : > { %s168_s11 = scalar_lea.vmem %s632_s2, %s440_s7  ;;  %s242_s21 = scalar_lea.vmem [#allocation2], %s239_s17 }
  0x2b   : > { %v443_v2 = vld [vmem:[%s168_s11] sm:$0xff]   ;;  %v450_v3 = vld [vmem:[%s168_s11 + $0x8] sm:$0xff]   ;;  %v247_v10 = vstv %s240_s18  ;;  %s177_s1 = scalar_lea.vmem %s634_s4, %s441_s22 }
  0x2c   : > { %v444_v4 = vunpack.c.l.bf16 %v443_v2  ;;  %v445_v5 = vunpack.c.h.bf16 %v443_v2  ;;  %v448_v6 = vunpack.c.l.bf16 %v450_v3  ;;  %v449_v7 = vunpack.c.h.bf16 %v450_v3 }
  0x2e   : > { %193 = vst.msk [vmem:[#allocation2] sm:$0xff] %vm192_vm0, %v444_v4  ;;  %194 = vst.msk [vmem:[#allocation2 + $0x8] sm:$0xff] %vm192_vm0, %v445_v5 }
  0x2f   : > { %195 = vst.msk [vmem:[#allocation2 + $0x10] sm:$0xff] %vm192_vm0, %v448_v6  ;;  %196 = vst.msk [vmem:[#allocation2 + $0x18] sm:$0xff] %vm192_vm0, %v449_v7 }
  0x30   : > { %197 = vst.msk [vmem:[#allocation2 + $0x20] sm:$0xff] %vm192_vm0, %v444_v4  ;;  %198 = vst.msk [vmem:[#allocation2 + $0x28] sm:$0xff] %vm192_vm0, %v445_v5 }
  0x31   : > { %199 = vst.msk [vmem:[#allocation2 + $0x30] sm:$0xff] %vm192_vm0, %v448_v6  ;;  %200 = vst.msk [vmem:[#allocation2 + $0x38] sm:$0xff] %vm192_vm0, %v449_v7 }
  0x38   : > { %v207_v11 = vld [vmem:[%s206_s19] sm:$0xff]  ;;  %v208_v12 = vld [vmem:[%s206_s19 + $0x8] sm:$0xff]  ;;  %v209_v23 = vld [vmem:[%s206_s19 + $0x10] sm:$0xff] }
  0x39   : > { %v225_v13 = vld [vmem:[%s224_s20] sm:$0xff]  ;;  %v212_v14 = vmul.f32 %v211_v8, %v207_v11  ;;  %v213_v15 = vmul.f32 %v211_v8, %v208_v12  ;;  %v226_v16 = vld [vmem:[%s224_s20 + $0x8] sm:$0xff]  ;;  %v210_v24 = vld [vmem:[%s206_s19 + $0x18] sm:$0xff]  ;;  %v214_v27 = vmul.f32 %v211_v8, %v209_v23 }
  0x3a   : > { %v230_v17 = vmul.f32 %v229_v9, %v225_v13  ;;  %v243_v18 = vld [vmem:[%s242_s21] sm:$0xff]  ;;  %v244_v19 = vld [vmem:[%s242_s21 + $0x8] sm:$0xff]  ;;  %v231_v20 = vmul.f32 %v229_v9, %v226_v16  ;;  %v227_v25 = vld [vmem:[%s224_s20 + $0x10] sm:$0xff]  ;;  %v215_v28 = vmul.f32 %v211_v8, %v210_v24 }
  0x3b   : > { %v248_v21 = vmul.f32 %v247_v10, %v243_v18  ;;  %v249_v22 = vmul.f32 %v247_v10, %v244_v19  ;;  %v228_v29 = vld [vmem:[%s224_s20 + $0x18] sm:$0xff]  ;;  %v232_v30 = vmul.f32 %v229_v9, %v227_v25  ;;  %v245_v31 = vld [vmem:[%s242_s21 + $0x10] sm:$0xff] }
  0x3c   : > { %v234_v26 = vadd.f32 %v230_v17, %v212_v14  ;;  %v246_v32 = vld [vmem:[%s242_s21 + $0x18] sm:$0xff]  ;;  %v235_v33 = vadd.f32 %v231_v20, %v213_v15  ;;  %v233_v34 = vmul.f32 %v229_v9, %v228_v29  ;;  %v250_v35 = vmul.f32 %v247_v10, %v245_v31 }
  0x3d   : > { %v251_v36 = vmul.f32 %v247_v10, %v246_v32  ;;  %v236_v38 = vadd.f32 %v232_v30, %v214_v27 }
  0x3e   : > { %v252_v37 = vadd.f32 %v248_v21, %v234_v26  ;;  %v253_v39 = vadd.f32 %v249_v22, %v235_v33  ;;  %v237_v40 = vadd.f32 %v233_v34, %v215_v28 }
  0x3f   : > { %v254_v41 = vadd.f32 %v250_v35, %v236_v38 }
  0x40   : > { %v256_v42 = vpack.c.bf16 %v253_v39, %v252_v37  ;;  %v255_v43 = vadd.f32 %v251_v36, %v237_v40 }
  0x42   : > { %459 = vmatprep.mubr.msk.bf16.mxu0 %vm192_vm0, %v256_v42  ;;  %v257_v44 = vpack.c.bf16 %v255_v43, %v254_v41 }
  0x44   : > { %460 = vmatmul.mubr.msk.bf16.vlgmr.msra.gmra.mrb[0].mxu0 %vm192_vm0, %v257_v44 }
 0x117   : > { %v461_v45 = vpop.f32.mrb[0].mxu0 }
 0x118   : > { %332 = vst.msk [vmem:[%s177_s1 + $0x10] sm:$0xff] %vm192_vm0, %v461_v45  ;;  %v315_v46 = vpop.f32.mrb[1].mxu0 }
 0x119   : > { %330 = vst.msk [vmem:[%s177_s1] sm:$0xff] %vm192_vm0, %v315_v46  ;;  %v462_v47 = vpop.f32.mrb[2].mxu0 }
 0x11a   : > { %333 = vst.msk [vmem:[%s177_s1 + $0x18] sm:$0xff] %vm192_vm0, %v462_v47  ;;  %v318_v48 = vpop.f32.mrb[3].mxu0 }
 0x11b   : > { %331 = vst.msk [vmem:[%s177_s1 + $0x8] sm:$0xff] %vm192_vm0, %v318_v48 }
 0x11c PF: > { %s24_s25 = sadd.s32 1, %s539_s25   ;;  %s636_s1 = smov %s535_s24 }
 0x11d   : > { %p21_p1 = scmp.ge.s32.totalorder %s24_s25, 4   ;;  %s637_s24 = smov %s639_s26 }
 0x11f   :  { %23 = sbr.rel (!%p21_p1) target bundleno = 27 (0x1b), region = 65 }

// kernel: encoder_layer_forward.8
= control target key start
LH: loop header
LB: loop body
LE: loop exit
PB: predicated region body
PF: predicated region fallthrough
CT: control target
= control target key end

     0   :  { %8 = vsyncpa [#allocation3], 0  ;;  %s686_s0 = inlined_call_operand.hbm [shape: bf16[64,32], index: 0, kind: input, shape index: {}]   ;;  %s687_s1 = inlined_call_operand.hbm [shape: bf16[32,128], index: 1, kind: input, shape index: {}]   ;;  %s688_s2 = inlined_call_operand.hbm [shape: bf16[128,32], index: 2, kind: input, shape index: {}]   ;;  %s689_s3 = inlined_call_operand.hbm [shape: bf16[64,32], index: 3, kind: output, shape index: {}]  }
   0x1   :  { %9 = vsyncpa [#allocation6], 0 }
   0x2   :  { %10 = vsyncpa [#allocation4], 0  ;;  %s581_s12 = smov [#allocation5]   ;;  %s582_s14 = smov [#allocation2]  }
   0x3   :  { %s28_s13 = sshll.u32 %s581_s12, 4  ;;  %s16_s15 = sshll.u32 %s582_s14, 4  ;;  %s29_s13 = int_to_ptr.vmem [resolvable:$true] %s28_s13  ;;  %s607_s15 = int_to_ptr.vmem [resolvable:$true] %s16_s15 }
   0x4   :  { %s487_s18 = scalar_lea.hbm %s687_s1, 256 }
   0x5   :  { %p488_p0 = scmp.ne.s32.totalorder %s687_s1, %s487_s18  ;;  %p491_p1 = scmp.lt.u32.totalorder %s487_s18, %s687_s1 }
   0x7   :  { %p493_p2 = pnand %p491_p1, %p488_p0 }
   0x9   :  { %496 = shalt.err (!%p493_p2)
}
   0xa   :  { %s497_s23 = scalar_lea.vmem %s29_s13, 256  ;;  %p502_p4 = scmp.lt.s32.totalorder %s29_s13, %s29_s13 }
   0xb   :  { %p498_p3 = scmp.ne.s32.totalorder %s29_s13, %s497_s23  ;;  %p503_p5 = scmp.lt.s32.totalorder %s497_s23, %s497_s23 }
   0xd   :  { %p504_p6 = por %p503_p5, %p502_p4 }
   0xf   :  { %p505_p7 = pnand %p504_p6, %p498_p3 }
  0x11   :  { %508 = shalt.err (!%p505_p7)
}
  0x12   :  { %s583_s24 = smov 64   ;;  %s584_s25 = smov 4  }
  0x13   :  { %34 = dma.hbm_to_vmem [thread:$0]  %s687_s1, 256, %s29_s13, [#allocation6], %s583_s24, %s583_s24, %s584_s25  }
  0x14   :  { %s509_s30 = scalar_lea.hbm %s686_s0, 512 }
  0x15   :  { %p510_p8 = scmp.ne.s32.totalorder %s686_s0, %s509_s30  ;;  %p513_p9 = scmp.lt.u32.totalorder %s509_s30, %s686_s0 }
  0x17   :  { %p515_p10 = pnand %p513_p9, %p510_p8 }
  0x19   :  { %518 = shalt.err (!%p515_p10)
}
  0x1a   :  { %s519_s8 = scalar_lea.vmem %s607_s15, 512  ;;  %p524_p12 = scmp.lt.s32.totalorder %s607_s15, %s607_s15 }
  0x1b   :  { %p520_p11 = scmp.ne.s32.totalorder %s607_s15, %s519_s8  ;;  %p525_p13 = scmp.lt.s32.totalorder %s519_s8, %s519_s8 }
  0x1d   :  { %p526_p0 = por %p525_p13, %p524_p12 }
  0x1f   :  { %p527_p1 = pnand %p526_p0, %p520_p11 }
  0x21   :  { %530 = shalt.err (!%p527_p1)
}
  0x22   :  { %22 = dma.hbm_to_vmem [thread:$0]  %s686_s0, 512, %s607_s15, [#allocation3], %s583_s24, %s583_s24, %s584_s25  }
  0x23   :  { %s585_s10 = smov [#allocation7]   ;;  %s531_s14 = scalar_lea.hbm %s688_s2, 1024 }
  0x24   :  { %s40_s11 = sshll.u32 %s585_s10, 4  ;;  %p532_p2 = scmp.ne.s32.totalorder %s688_s2, %s531_s14  ;;  %s41_s11 = int_to_ptr.vmem [resolvable:$true] %s40_s11 }
  0x25   :  { %p535_p3 = scmp.lt.u32.totalorder %s531_s14, %s688_s2 }
  0x27   :  { %p537_p4 = pnand %p535_p3, %p532_p2 }
  0x29   :  { %540 = shalt.err (!%p537_p4)
}
  0x2a   :  { %s541_s20 = scalar_lea.vmem %s41_s11, 1024  ;;  %p546_p6 = scmp.lt.s32.totalorder %s41_s11, %s41_s11 }
  0x2b   :  { %p542_p5 = scmp.ne.s32.totalorder %s41_s11, %s541_s20  ;;  %p547_p7 = scmp.lt.s32.totalorder %s541_s20, %s541_s20 }
  0x2d   :  { %p548_p8 = por %p547_p7, %p546_p6 }
  0x2f   :  { %p549_p9 = pnand %p548_p8, %p542_p5 }
  0x31   :  { %552 = shalt.err (!%p549_p9)
}
  0x32   :  { %46 = dma.hbm_to_vmem [thread:$0]  %s688_s2, 1024, %s41_s11, [#allocation6], %s583_s24, %s583_s24, %s584_s25  }
  0x33   :  { %575 = dma.done.wait [#allocation3], 512  }
  0x34   :  { %576 = vsyncadd [#allocation3], 4294966784 }
  0x35   :  { %577 = dma.done.wait [#allocation6], 1280  }
  0x36   :  { %578 = vsyncadd [#allocation6], 4294966016  ;;  %v473_v0 = vld [vmem:[#allocation5] sm:$0xff]   ;;  %v474_v1 = vld [vmem:[#allocation5 + $0x8] sm:$0xff]   ;;  %vm101_vm0 = vcmask 261120   ;;  %vm352_vm1 = vcmask 257024  }
  0x37   :  { %431 = vmatprep.subr.bf16.mxu0 %v473_v0  ;;  %v475_v2 = vld [vmem:[#allocation2] sm:$0xff]   ;;  %v476_v3 = vld [vmem:[#allocation2 + $0x8] sm:$0xff]   ;;  %v477_v4 = vld [vmem:[#allocation2 + $0x10] sm:$0xff]   ;;  %s586_s2 = smov [#allocation8]  }
  0x38   :  { %432 = vmatpush3.bf16.msra.mxu0 %v473_v0  ;;  %435 = vmatprep.mubr.msk.bf16.mxu0 %vm101_vm0, %v475_v2  ;;  %v479_v5 = vld [vmem:[#allocation7] sm:$0xff]   ;;  %v480_v6 = vld [vmem:[#allocation7 + $0x8] sm:$0xff]   ;;  %v481_v7 = vld [vmem:[#allocation7 + $0x10] sm:$0xff]   ;;  %s366_s21 = sshll.u32 %s586_s2, 4  ;;  %s367_s21 = int_to_ptr.vmem [resolvable:$true] %s366_s21 }
  0x39   :  { %433 = vmatprep.subr.bf16.mxu0 %v474_v1  ;;  %443 = vmatprep.subr.bf16.mxu1 %v479_v5  ;;  %v478_v8 = vld [vmem:[#allocation2 + $0x18] sm:$0xff]   ;;  %v482_v9 = vld [vmem:[#allocation7 + $0x18] sm:$0xff]   ;;  %v483_v10 = vld [vmem:[#allocation7 + $0x20] sm:$0xff]   ;;  %s553_s22 = scalar_lea.vmem %s367_s21, 512  ;;  %p558_p11 = scmp.lt.s32.totalorder %s367_s21, %s367_s21 }
  0x3a   :  { %444 = vmatpush3.bf16.msra.mxu1 %v479_v5  ;;  %v484_v11 = vld [vmem:[#allocation7 + $0x28] sm:$0xff]   ;;  %v485_v12 = vld [vmem:[#allocation7 + $0x30] sm:$0xff]   ;;  %v486_v13 = vld [vmem:[#allocation7 + $0x38] sm:$0xff]   ;;  %p554_p10 = scmp.ne.s32.totalorder %s367_s21, %s553_s22  ;;  %p559_p12 = scmp.lt.s32.totalorder %s553_s22, %s553_s22 }
  0x3b   :  { %445 = vmatprep.subr.bf16.mxu1 %v480_v6 }
  0x3c   :  { %434 = vmatpush3.bf16.msra.mxu0 %v474_v1  ;;  %p560_p13 = por %p559_p12, %p558_p11 }
  0x3e   :  { %446 = vmatpush3.bf16.msra.mxu1 %v480_v6  ;;  %p561_p0 = pnand %p560_p13, %p554_p10 }
  0x3f   :  { %436 = vmatmul.mubr.msk.bf16.vlgmr.msra.gmra.mrb[0].mxu0 %vm101_vm0, %v476_v3  ;;  %447 = vmatprep.subr.bf16.mxu1 %v481_v7 }
  0x40   :  { %439 = vmatprep.mubr.msk.bf16.mxu0 %vm101_vm0, %v477_v4 }
  0x42   :  { %448 = vmatpush3.bf16.msra.mxu1 %v481_v7 }
  0x43   :  { %449 = vmatprep.subr.bf16.mxu1 %v482_v9 }
  0x46   :  { %450 = vmatpush3.bf16.msra.mxu1 %v482_v9 }
  0x47   :  { %440 = vmatmul.mubr.msk.bf16.gmra.mrb[4].mxu0 %vm101_vm0, %v478_v8  ;;  %451 = vmatprep.subr.bf16.mxu1 %v483_v10 }
  0x4a   :  { %452 = vmatpush3.bf16.msra.mxu1 %v483_v10 }
  0x4b   :  { %453 = vmatprep.subr.bf16.mxu1 %v484_v11 }
  0x4e   :  { %454 = vmatpush3.bf16.msra.mxu1 %v484_v11 }
  0x4f   :  { %455 = vmatprep.subr.bf16.mxu1 %v485_v12 }
  0x52   :  { %456 = vmatpush3.bf16.msra.mxu1 %v485_v12 }
  0x53   :  { %457 = vmatprep.subr.bf16.mxu1 %v486_v13 }
  0x56   :  { %458 = vmatpush3.bf16.msra.mxu1 %v486_v13 }
 0x112   :  { %v437_v14 = vpop.f32.mrb[0].mxu0 }
 0x113   :  { %v148_v15 = vpop.f32.mrb[1].mxu0  ;;  %v181_v17 = vmax.f32 %v437_v14, 0.0 }
 0x114   :  { %v438_v16 = vpop.f32.mrb[2].mxu0  ;;  %v179_v20 = vmax.f32 %v148_v15, 0.0 }
 0x115   :  { %v182_v18 = vmax.f32 %v438_v16, 0.0  ;;  %v151_v19 = vpop.f32.mrb[3].mxu0 }
 0x116   :  { %v180_v21 = vmax.f32 %v151_v19, 0.0 }
 0x117   :  { %v188_v22 = vpack.c.bf16 %v182_v18, %v181_v17 }
 0x118   :  { %v187_v23 = vpack.c.bf16 %v180_v21, %v179_v20 }
 0x11a   :  { %v441_v24 = vpop.f32.mrb[4].mxu0  ;;  %459 = vmatprep.mubr.bf16.mxu1 %v187_v23 }
 0x11b   :  { %v164_v25 = vpop.f32.mrb[5].mxu0  ;;  %460 = vmatmul.mubr.bf16.vlgmr.msra.gmra.mrb[0].mxu1 %v188_v22  ;;  %v185_v27 = vmax.f32 %v441_v24, 0.0 }
 0x11c   :  { %v442_v26 = vpop.f32.mrb[6].mxu0  ;;  %v183_v30 = vmax.f32 %v164_v25, 0.0 }
 0x11d   :  { %v186_v28 = vmax.f32 %v442_v26, 0.0  ;;  %v167_v29 = vpop.f32.mrb[7].mxu0 }
 0x11e   :  { %v184_v31 = vmax.f32 %v167_v29, 0.0 }
 0x11f   :  { %v190_v32 = vpack.c.bf16 %v186_v28, %v185_v27 }
 0x120   :  { %v189_v33 = vpack.c.bf16 %v184_v31, %v183_v30 }
 0x122   :  { %463 = vmatprep.mubr.bf16.mxu1 %v189_v33 }
 0x123   :  { %464 = vmatmul.mubr.bf16.gmra.mrb[4].mxu1 %v190_v32 }
 0x1ee   :  { %v461_v34 = vpop.f32.mrb[0].mxu1 }
 0x1ef   :  { %v407_v35 = vpack.c.bf16 %v461_v34, %v461_v34  ;;  %v289_v36 = vpop.f32.mrb[1].mxu1 }
 0x1f0   :  { %v405_v37 = vpack.c.bf16 %v289_v36, %v289_v36  ;;  %v462_v38 = vpop.f32.mrb[2].mxu1 }
 0x1f1   :  { %355 = vst.msk [vmem:[#allocation8 + $0x8] sm:$0xf] %vm352_vm1, %v407_v35  ;;  %v408_v39 = vpack.c.bf16 %v462_v38, %v462_v38  ;;  %v292_v40 = vpop.f32.mrb[3].mxu1 }
 0x1f2   :  { %353 = vst.msk [vmem:[#allocation8] sm:$0xf] %vm352_vm1, %v405_v37  ;;  %v406_v41 = vpack.c.bf16 %v292_v40, %v292_v40 }
 0x1f3   :  { %356 = vst.msk [vmem:[#allocation8 + $0xc] sm:$0xf] %vm352_vm1, %v408_v39 }
 0x1f4   :  { %354 = vst.msk [vmem:[#allocation8 + $0x4] sm:$0xf] %vm352_vm1, %v406_v41 }
 0x1f6   :  { %v465_v42 = vpop.f32.mrb[4].mxu1 }
 0x1f7   :  { %v411_v43 = vpack.c.bf16 %v465_v42, %v465_v42  ;;  %v305_v44 = vpop.f32.mrb[5].mxu1 }
 0x1f8   :  { %v409_v45 = vpack.c.bf16 %v305_v44, %v305_v44  ;;  %v466_v46 = vpop.f32.mrb[6].mxu1 }
 0x1f9   :  { %359 = vst.msk [vmem:[#allocation8 + $0x18] sm:$0xf] %vm352_vm1, %v411_v43  ;;  %v412_v47 = vpack.c.bf16 %v466_v46, %v466_v46  ;;  %v308_v48 = vpop.f32.mrb[7].mxu1 }
 0x1fa   :  { %357 = vst.msk [vmem:[#allocation8 + $0x10] sm:$0xf] %vm352_vm1, %v409_v45  ;;  %v410_v49 = vpack.c.bf16 %v308_v48, %v308_v48 }
 0x1fb   :  { %360 = vst.msk [vmem:[#allocation8 + $0x1c] sm:$0xf] %vm352_vm1, %v412_v47 }
 0x1fc   :  { %358 = vst.msk [vmem:[#allocation8 + $0x14] sm:$0xf] %vm352_vm1, %v410_v49 }
 0x1fd   :  { %564 = shalt.err (!%p561_p0)
}
 0x1fe   :  { %s565_s27 = scalar_lea.hbm %s689_s3, 512 }
 0x1ff   :  { %p566_p1 = scmp.ne.s32.totalorder %s689_s3, %s565_s27  ;;  %p569_p2 = scmp.lt.u32.totalorder %s565_s27, %s689_s3 }
 0x201   :  { %p571_p3 = pnand %p569_p2, %p566_p1 }
 0x203   :  { %574 = shalt.err (!%p571_p3)
}
 0x204   :  { %372 = dma.vmem_to_hbm [thread:$0]  %s367_s21, 512, %s689_s3, [#allocation4], %s583_s24, %s583_s24, %s584_s25  }
 0x205   :  { %579 = dma.done.wait [#allocation4], 512  }
 0x206   :  { %580 = vsyncadd [#allocation4], 4294966784 }
 0x207   :  { %376 = vsyncpa [#allocation3], 1 }
 0x208   :  { %377 = vsyncpa [#allocation6], 1 }
 0x209   :  { %378 = vsyncpa [#allocation4], 1 }

// kernel: encoder_layer_forward.9
= control target key start
LH: loop header
LB: loop body
LE: loop exit
PB: predicated region body
PF: predicated region fallthrough
CT: control target
= control target key end

     0   :  { %7 = vsyncpa [#allocation3], 0  ;;  %s1004_s0 = inlined_call_operand.hbm [shape: bf16[2,32,32], index: 0, kind: input, shape index: {}]   ;;  %s1005_s1 = inlined_call_operand.hbm [shape: f32[2,32,32], index: 1, kind: input, shape index: {}]   ;;  %s1006_s2 = inlined_call_operand.hbm [shape: f32[2,32,32], index: 2, kind: output, shape index: {}]  }
   0x1   :  { %9 = vsyncpa [#allocation3 + $0x1], 0 }
   0x2   :  { %10 = vsyncpa [#allocation6], 0 }
   0x3   :  { %12 = vsyncpa [#allocation6 + $0x1], 0 }
   0x4   :  { %13 = vsyncpa [#allocation4], 0 }
   0x5   :  { %15 = vsyncpa [#allocation4 + $0x1], 0  ;;  %s722_s9 = smov 0   ;;  %s724_s10 = smov 0  }
   0x6   :  { %s726_s11 = smov 0   ;;  %s728_s12 = smov 0  }
   0x7 LB: > { %s743_s13 = sadd.s32 4294967295, %s696_s12   ;;  %s479_s14 = sadd.s32 4294967294, %s696_s12   ;;  %s696_s12 = sphi %s728_s12, %s1022_s12   ;;  %s692_s11 = sphi %s726_s11, %s1021_s11   ;;  %s688_s10 = sphi %s724_s10, %s1020_s10   ;;  %s684_s9 = sphi %s722_s9, %s1019_s9  }
   0x8   : > { %s747_s15 = sadd.s32 1, %s696_s12   ;;  %s28_s16 = sadd.s32 1, %s692_s11 }
   0x9   : > { %s25_s17 = ssub.s32 %s696_s12, %s747_s15  ;;  %p35_p0 = scmp.ne.s32.totalorder %s692_s11, %s688_s10 }
   0xa   : > { %p26_p1 = scmp.eq.s32.totalorder %s25_s17, 0  ;;  %p36_p2 = scmp.eq.s32.totalorder %s696_s12, 0 }
   0xb   : > { %p41_p3 = scmp.ne.s32.totalorder %s688_s10, %s684_s9  ;;  %p42_p4 = scmp.eq.s32.totalorder %s743_s13, 0 }
   0xc   : > { %s759_s18 = scalar_select %p26_p1, %s692_s11, %s28_s16  }
   0xd   : > { %p761_p5 = por %p36_p2, %p35_p0  ;;  %p765_p6 = por %p42_p4, %p41_p3 }
   0xe   : > { %p91_p7 = scmp.eq.s32.totalorder %s743_s13, 1  ;;  %p97_p8 = scmp.eq.s32.totalorder %s479_s14, 1 }
   0xf   : > { %s1010_s20 = scalar_select %p765_p6, 1, 0 }
  0x10   : > { %p526_p10 = scmp.lt.s32.totalorder %s696_s12, 2  ;;  %p772_p11 = por %p91_p7, %p35_p0 }
  0x11   : > { %p776_p12 = por %p97_p8, %p41_p3  ;;  %s781_s23 = sand.u32 1, %s692_s11  }
  0x12   : > { %s1011_s21 = scalar_select %p772_p11, 1, 0 }
  0x13   : > { %s1012_s22 = scalar_select %p776_p12, 1, 0 }
  0x14   : > { %s497_s24 = sshll.u32 %s696_s12, 8  ;;  %s482_s25 = sshll.u32 %s781_s23, 4 }
  0x15   : > { %s788_s28 = scalar_lea.hbm %s1004_s0, %s497_s24  ;;  %s121_s29 = scalar_lea.vmem [#allocation2], %s482_s25 }
  0x16   : > { %s128_s30 = sshll.u32 %s121_s29, 4  ;;  %p792_p13 = pnand %p526_p10, %p761_p5  ;;  %s796_s30 = int_to_ptr.vmem [resolvable:$true] %s128_s30 }
  0x17   : > { %s118_s4 = scalar_lea.sflag [#allocation3], %s781_s23  ;;  %s566_s5 = scalar_lea.hbm %s788_s28, 256 }
  0x18   : > { %p567_p0 = scmp.ne.s32.totalorder %s788_s28, %s566_s5  ;;  %p568_p1 = pneg %p792_p13 }
  0x19   : > { %s571_s8 = scalar_lea.hbm %s1004_s0, 512  ;;  %p572_p4 = scmp.lt.u32.totalorder %s788_s28, %s1004_s0 }
  0x1a   : > { %p569_p2 = pnand %p568_p1, %p567_p0  ;;  %p573_p5 = scmp.lt.u32.totalorder %s571_s8, %s566_s5 }
  0x1b   : > { %p575_p8 = scmp.lt.u32.totalorder %s566_s5, %s788_s28 }
  0x1c   : > { %p570_p3 = pneg %p569_p2  ;;  %p574_p7 = por %p573_p5, %p572_p4 }
  0x1e   : > { %p576_p10 = por %p575_p8, %p574_p7 }
  0x20   : > { %p577_p9 = pnand %p576_p10, %p570_p3 }
  0x22   : > { %580 = shalt.err (!%p577_p9)
}
  0x23   : > { %s581_s17 = scalar_lea.vmem %s796_s30, 256  ;;  %s698_s19 = smov [#allocation2]  }
  0x24   : > { %p582_p0 = scmp.ne.s32.totalorder %s796_s30, %s581_s17  ;;  %s586_s24 = sshll.u32 %s698_s19, 4  ;;  %s587_s24 = int_to_ptr.vmem [resolvable:$false] %s586_s24 }
  0x25   : > { %s588_s25 = scalar_lea.vmem %s587_s24, 512  ;;  %p589_p11 = scmp.lt.s32.totalorder %s796_s30, %s587_s24 }
  0x26   : > { %p584_p2 = pnand %p582_p0, %p568_p1  ;;  %p590_p4 = scmp.lt.s32.totalorder %s588_s25, %s581_s17 }
  0x28   : > { %p585_p12 = pneg %p584_p2  ;;  %p591_p5 = por %p590_p4, %p589_p11 }
  0x2a   : > { %p592_p7 = pnand %p591_p5, %p585_p12 }
  0x2c   : > { %595 = shalt.err (!%p592_p7)
}
  0x2d   : > { %s699_s26 = smov 64   ;;  %s700_s27 = smov 4  }
  0x2e   : > { %518 = dma.hbm_to_vmem [thread:$0]  (!%p792_p13), %s788_s28, 256, %s796_s30, %s118_s4, %s699_s26, %s699_s26, %s700_s27  }
  0x2f   : > { %p488_p9 = scmp.ge.s32.totalorder %s696_s12, 1  ;;  %p157_p3 = scmp.lt.s32.totalorder %s696_s12, 3 }
  0x30   : > { %s485_s29 = sshll.u32 %s781_s23, 5  ;;  %s498_s6 = sshll.u32 %s696_s12, 9 }
  0x31   : > { %p829_p11 = pnand %p488_p9, %p157_p3  ;;  %s142_s7 = scalar_lea.vmem [#allocation5], %s485_s29 }
  0x32   : > { %s149_s8 = sshll.u32 %s142_s7, 4  ;;  %s837_s17 = scalar_lea.hbm %s1005_s1, %s498_s6  ;;  %s839_s8 = int_to_ptr.vmem [resolvable:$true] %s149_s8 }
  0x33   : > { %s139_s28 = scalar_lea.sflag [#allocation6], %s781_s23  ;;  %s596_s30 = scalar_lea.hbm %s837_s17, 512 }
  0x34   : > { %p597_p12 = scmp.ne.s32.totalorder %s837_s17, %s596_s30  ;;  %s601_s24 = scalar_lea.hbm %s1005_s1, 1024 }
  0x35   : > { %p602_p0 = scmp.lt.u32.totalorder %s837_s17, %s1005_s1  ;;  %p603_p2 = scmp.lt.u32.totalorder %s601_s24, %s596_s30 }
  0x36   : > { %p599_p8 = pnand %p597_p12, %p568_p1  ;;  %p605_p5 = scmp.lt.u32.totalorder %s596_s30, %s837_s17 }
  0x37   : > { %p604_p4 = por %p603_p2, %p602_p0 }
  0x38   : > { %p600_p10 = pneg %p599_p8 }
  0x39   : > { %p606_p7 = por %p605_p5, %p604_p4 }
  0x3b   : > { %p607_p9 = pnand %p606_p7, %p600_p10 }
  0x3d   : > { %610 = shalt.err (!%p607_p9)
}
  0x3e   : > { %s611_s27 = scalar_lea.vmem %s839_s8, 512  ;;  %s701_s29 = smov [#allocation5]  }
  0x3f   : > { %p612_p3 = scmp.ne.s32.totalorder %s839_s8, %s611_s27  ;;  %s616_s6 = sshll.u32 %s701_s29, 4  ;;  %s617_s6 = int_to_ptr.vmem [resolvable:$false] %s616_s6 }
  0x40   : > { %s618_s7 = scalar_lea.vmem %s617_s6, 1024  ;;  %p619_p6 = scmp.lt.s32.totalorder %s839_s8, %s617_s6 }
  0x41   : > { %p614_p12 = pnand %p612_p3, %p568_p1  ;;  %p620_p0 = scmp.lt.s32.totalorder %s618_s7, %s611_s27 }
  0x43   : > { %p615_p8 = pneg %p614_p12  ;;  %p621_p2 = por %p620_p0, %p619_p6 }
  0x45   : > { %p622_p4 = pnand %p621_p2, %p615_p8 }
  0x47   : > { %625 = shalt.err (!%p622_p4)
}
  0x48   : > { %s702_s14 = smov 128   ;;  %s703_s16 = smov 8  }
  0x49   : > { %521 = dma.hbm_to_vmem [thread:$0]  (!%p792_p13), %s837_s17, 512, %s839_s8, %s139_s28, %s702_s14, %s702_s14, %s703_s16  }
  0x4a   : > { %161 = sbr.rel (%p829_p11) target bundleno = 137 (0x89), region = 28  ;;  %s870_s30 = sand.u32 (!%p829_p11), 1, %s688_s10  }
  0x4b   : > { %s489_s4 = sshll.u32 (!%p829_p11), %s870_s30, 4  ;;  %s164_s19 = scalar_lea.sflag (!%p829_p11), [#allocation3], %s870_s30 }
  0x4c   : > { %s167_s24 = scalar_lea.vmem (!%p829_p11), [#allocation2], %s489_s4  ;;  %p1015_p6 = scmp.ne.s32.totalorder (!%p829_p11), %s1010_s20, 0 }
  0x51   : > { %671 = dma.done.wait (%p1015_p6), %s164_s19, 256  }
  0x52   : > { %673 = vsyncadd (%p1015_p6), %s164_s19, 4294967040  ;;  %s490_s23 = sshll.u32 %s870_s30, 5  ;;  %s173_s3 = scalar_lea.sflag [#allocation6], %s870_s30 }
  0x53   : > { %s176_s5 = scalar_lea.vmem [#allocation5], %s490_s23 }
  0x54   : > { %675 = dma.done.wait (%p1015_p6), %s173_s3, 512  }
  0x55   : > { %677 = vsyncadd (%p1015_p6), %s173_s3, 4294966784  ;;  %v218_v0 = vlaneseq  ;;  %v501_v2 = vld [vmem:[%s167_s24] sm:$0xff]   ;;  %v508_v3 = vld [vmem:[%s167_s24 + $0x8] sm:$0xff]   ;;  %vm231_vm0 = vcmask 1043456   ;;  %vm249_vm1 = vcmask 1046528   ;;  %vm284_vm2 = vcmask 1045504  }
  0x56   : > { %v210_v4 = vld [vmem:[%s176_s5] sm:$0xff]  ;;  %v502_v7 = vunpack.c.l.bf16 %v501_v2  ;;  %v503_v8 = vunpack.c.h.bf16 %v501_v2  ;;  %v506_v9 = vunpack.c.l.bf16 %v508_v3  ;;  %v507_v10 = vunpack.c.h.bf16 %v508_v3  ;;  %v211_v11 = vld [vmem:[%s176_s5 + $0x8] sm:$0xff]  ;;  %v212_v12 = vld [vmem:[%s176_s5 + $0x10] sm:$0xff]  ;;  %s201_s20 = scalar_lea.vmem [#allocation7], %s490_s23  ;;  %s499_s17 = sshll.u32 %s743_s13, 9 }
  0x57   : > { %v219_v1 = vshrl.u32 %v218_v0, 7  ;;  %v213_v13 = vld [vmem:[%s176_s5 + $0x18] sm:$0xff]  ;;  %vm364_vm3 = vcmask 261120   ;;  %s383_s8 = sshll.u32 %s201_s20, 4  ;;  %s955_s26 = scalar_lea.hbm %s1006_s2, %s499_s17  ;;  %s950_s8 = int_to_ptr.vmem [resolvable:$true] %s383_s8 }
  0x58   : > { %v886_v14 = vadd.f32 %v502_v7, %v210_v4  ;;  %v888_v15 = vadd.f32 %v503_v8, %v211_v11  ;;  %v890_v16 = vadd.f32 %v506_v9, %v212_v12  ;;  %v892_v17 = vadd.f32 %v507_v10, %v213_v13  ;;  %s370_s13 = scalar_lea.sflag [#allocation4], %s870_s30  ;;  %s626_s27 = scalar_lea.vmem %s950_s8, 512 }
  0x59   : > { %v220_v5 = vsub.s32 0, %v219_v1  ;;  %v224_v6 = vsub.s32 7, %v219_v1  ;;  %p627_p13 = scmp.ne.s32.totalorder %s950_s8, %s626_s27  ;;  %p1016_p1 = scmp.ne.s32.totalorder %s1011_s21, 0 }
  0x5a   : > { %v232_v20 = vrot.slane %v886_v14, 4  ;;  %v233_v21 = vrot.slane %v888_v15, 4  ;;  %v235_v22 = vrot.slane %v890_v16, 4  ;;  %v237_v23 = vrot.slane %v892_v17, 4  ;;  %s704_s29 = smov [#allocation7]  }
  0x5b   : > { %v221_v18 = vrot.slane %v886_v14, %v220_v5  ;;  %v896_v19 = vrot.slane %v892_v17, %v224_v6  ;;  %p628_p11 = pnand %p627_p13, %p1016_p1  ;;  %s630_s6 = sshll.u32 %s704_s29, 4  ;;  %s631_s6 = int_to_ptr.vmem [resolvable:$false] %s630_s6 }
  0x5c   : > { %v234_v24 = vsel %vm231_vm0, %v232_v20, %v233_v21  ;;  %v906_v28 = vsel %vm231_vm0, %v233_v21, %v235_v22  ;;  %v909_v29 = vsel %vm231_vm0, %v235_v22, %v237_v23  ;;  %s632_s7 = scalar_lea.vmem %s631_s6, 1024  ;;  %p633_p5 = scmp.lt.s32.totalorder %s950_s8, %s631_s6 }
  0x5d   : > { %v245_v25 = vsel %vm231_vm0, %v221_v18, %v232_v20  ;;  %v250_v26 = vrot.slane %v221_v18, 1  ;;  %v261_v27 = vrot.slane %v896_v19, 1  ;;  %v913_v30 = vsel %vm231_vm0, %v237_v23, %v896_v19  ;;  %p629_p10 = pneg %p628_p11  ;;  %p634_p7 = scmp.lt.s32.totalorder %s632_s7, %s626_s27 }
  0x5e   : > { %v251_v31 = vrot.slane %v245_v25, 1  ;;  %v253_v32 = vrot.slane %v234_v24, 1  ;;  %v255_v33 = vrot.slane %v906_v28, 1  ;;  %v257_v34 = vrot.slane %v909_v29, 1 }
  0x5f   : > { %v259_v35 = vrot.slane %v913_v30, 1  ;;  %v276_v37 = vadd.f32 %v261_v27, %v896_v19  ;;  %p635_p9 = por %p634_p7, %p633_p5 }
  0x60   : > { %v252_v36 = vsel %vm249_vm1, %v250_v26, %v251_v31  ;;  %v254_v38 = vsel %vm249_vm1, %v251_v31, %v253_v32  ;;  %v256_v39 = vsel %vm249_vm1, %v253_v32, %v255_v33  ;;  %v258_v40 = vsel %vm249_vm1, %v255_v33, %v257_v34 }
  0x61   : > { %v260_v41 = vsel %vm249_vm1, %v257_v34, %v259_v35  ;;  %v270_v42 = vadd.f32 %v252_v36, %v221_v18  ;;  %v271_v43 = vadd.f32 %v254_v38, %v245_v25  ;;  %v272_v44 = vadd.f32 %v256_v39, %v234_v24  ;;  %p636_p3 = pnand %p635_p9, %p629_p10 }
  0x62   : > { %v273_v45 = vadd.f32 %v258_v40, %v906_v28  ;;  %v274_v46 = vadd.f32 %v260_v41, %v909_v29  ;;  %v262_v47 = vsel %vm249_vm1, %v259_v35, %v261_v27  ;;  %v296_v48 = vrot.slane %v276_v37, 2 }
  0x63   : > { %v285_v49 = vrot.slane %v270_v42, 2  ;;  %v286_v50 = vrot.slane %v271_v43, 2  ;;  %v288_v51 = vrot.slane %v272_v44, 2  ;;  %v275_v54 = vadd.f32 %v262_v47, %v913_v30 }
  0x64   : > { %v290_v52 = vrot.slane %v273_v45, 2  ;;  %v292_v53 = vrot.slane %v274_v46, 2  ;;  %v311_v58 = vadd.f32 %v296_v48, %v276_v37 }
  0x65   : > { %v287_v55 = vsel %vm284_vm2, %v285_v49, %v286_v50  ;;  %v289_v56 = vsel %vm284_vm2, %v286_v50, %v288_v51  ;;  %v294_v0 = vrot.slane %v275_v54, 2 }
  0x66   : > { %v291_v57 = vsel %vm284_vm2, %v288_v51, %v290_v52  ;;  %v293_v59 = vsel %vm284_vm2, %v290_v52, %v292_v53  ;;  %v305_v60 = vadd.f32 %v287_v55, %v270_v42  ;;  %v306_v61 = vadd.f32 %v289_v56, %v271_v43 }
  0x67   : > { %v307_v62 = vadd.f32 %v291_v57, %v272_v44  ;;  %v308_v63 = vadd.f32 %v293_v59, %v273_v45  ;;  %v295_v5 = vsel %vm284_vm2, %v292_v53, %v294_v0  ;;  %v297_v6 = vsel %vm284_vm2, %v294_v0, %v296_v48 }
  0x68   : > { %v319_v1 = vrot.slane %v305_v60, 4  ;;  %v320_v2 = vrot.slane %v306_v61, 4  ;;  %v330_v7 = vrot.slane %v311_v58, 4  ;;  %v309_v10 = vadd.f32 %v295_v5, %v274_v46 }
  0x69   : > { %v322_v3 = vrot.slane %v307_v62, 4  ;;  %v324_v4 = vrot.slane %v308_v63, 4  ;;  %v310_v11 = vadd.f32 %v297_v6, %v275_v54 }
  0x6a   : > { %v321_v8 = vsel %vm231_vm0, %v319_v1, %v320_v2  ;;  %v326_v21 = vrot.slane %v309_v10, 4 }
  0x6b   : > { %v323_v9 = vsel %vm231_vm0, %v320_v2, %v322_v3  ;;  %v325_v12 = vsel %vm231_vm0, %v322_v3, %v324_v4  ;;  %v338_v13 = vadd.f32 %v321_v8, %v305_v60  ;;  %v328_v22 = vrot.slane %v310_v11, 4 }
  0x6c   : > { %v339_v18 = vadd.f32 %v323_v9, %v306_v61  ;;  %v340_v20 = vadd.f32 %v325_v12, %v307_v62  ;;  %v327_v24 = vsel %vm231_vm0, %v324_v4, %v326_v21 }
  0x6d   : > { %v329_v26 = vsel %vm231_vm0, %v326_v21, %v328_v22  ;;  %v331_v27 = vsel %vm231_vm0, %v328_v22, %v330_v7  ;;  %v341_v32 = vadd.f32 %v327_v24, %v308_v63 }
  0x6e   : > { %v344_v23 = vadd.f32 %v339_v18, %v338_v13  ;;  %v345_v25 = vadd.f32 %v340_v20, %v339_v18  ;;  %v342_v33 = vadd.f32 %v329_v26, %v309_v10  ;;  %v343_v34 = vadd.f32 %v331_v27, %v310_v11 }
  0x6f   : > { %v346_v37 = vadd.f32 %v341_v32, %v340_v20 }
  0x70   : > { %v348_v31 = vadd.f32 %v344_v23, %v340_v20  ;;  %v349_v36 = vadd.f32 %v345_v25, %v341_v32  ;;  %v347_v38 = vadd.f32 %v342_v33, %v341_v32 }
  0x71   : > { %v350_v41 = vadd.f32 %v346_v37, %v342_v33 }
  0x72   : > { %v352_v35 = vadd.f32 %v348_v31, %v906_v28  ;;  %v353_v40 = vadd.f32 %v349_v36, %v909_v29  ;;  %v351_v42 = vadd.f32 %v347_v38, %v343_v34 }
  0x73   : > { %v354_v45 = vadd.f32 %v350_v41, %v913_v30 }
  0x74   : > { %v356_v39 = vmul.f32 0.04, %v352_v35  ;;  %v357_v44 = vmul.f32 0.04, %v353_v40  ;;  %v355_v28 = vadd.f32 %v351_v42, %v896_v19 }
  0x75   : > { %v358_v46 = vmul.f32 0.04, %v354_v45 }
  0x76   : > { %v360_v43 = vsub.f32 %v886_v14, %v356_v39  ;;  %v361_v29 = vsub.f32 %v888_v15, %v357_v44  ;;  %v359_v47 = vmul.f32 0.04, %v355_v28 }
  0x77   : > { %v362_v14 = vsub.f32 %v890_v16, %v358_v46 }
  0x78   : > { %365 = vst.msk [vmem:[%s201_s20] sm:$0xff] %vm364_vm3, %v360_v43  ;;  %366 = vst.msk [vmem:[%s201_s20 + $0x8] sm:$0xff] %vm364_vm3, %v361_v29  ;;  %v363_v19 = vsub.f32 %v892_v17, %v359_v47 }
  0x79   : > { %367 = vst.msk [vmem:[%s201_s20 + $0x10] sm:$0xff] %vm364_vm3, %v362_v14 }
  0x7a   : > { %368 = vst.msk [vmem:[%s201_s20 + $0x18] sm:$0xff] %vm364_vm3, %v363_v19 }
  0x7b   : > { %639 = shalt.err (!%p636_p3)
}
  0x7c   : > { %s640_s14 = scalar_lea.hbm %s955_s26, 512  ;;  %s644_s19 = scalar_lea.hbm %s1006_s2, 1024 }
  0x7d   : > { %p641_p12 = scmp.ne.s32.totalorder %s955_s26, %s640_s14  ;;  %p645_p2 = scmp.lt.u32.totalorder %s955_s26, %s1006_s2 }
  0x7e   : > { %p646_p4 = scmp.lt.u32.totalorder %s644_s19, %s640_s14  ;;  %p648_p13 = scmp.lt.u32.totalorder %s640_s14, %s955_s26 }
  0x7f   : > { %p642_p8 = pnand %p641_p12, %p1016_p1 }
  0x80   : > { %p647_p6 = por %p646_p4, %p645_p2 }
  0x81   : > { %p643_p0 = pneg %p642_p8 }
  0x82   : > { %p649_p11 = por %p648_p13, %p647_p6 }
  0x84   : > { %p650_p10 = pnand %p649_p11, %p643_p0 }
  0x86   : > { %653 = shalt.err (!%p650_p10)
}
  0x87   : > { %s705_s3 = smov 128   ;;  %s706_s5 = smov 8  }
  0x88   : > { %513 = dma.vmem_to_hbm [thread:$0]  (%p1016_p1), %s950_s8, 512, %s955_s26, %s370_s13, %s705_s3, %s705_s3, %s706_s5  }
  0x89 PF: > { %s398_s20 = sand.u32 1, %s684_s9   ;;  %p1017_p5 = scmp.ne.s32.totalorder %s1012_s22, 0 }
  0x8a   : > { %p1018_p7 = scmp.ge.s32.totalorder %s696_s12, 2  ;;  %s399_s17 = scalar_lea.sflag [#allocation4], %s398_s20 }
  0x8c   : > { %p523_p9 = pnand %p1018_p7, %p1017_p5 }
  0x8e   : > { %679 = dma.done.wait (!%p523_p9), %s399_s17, 512  }
  0x8f   : > { %681 = vsyncadd (!%p523_p9), %s399_s17, 4294966784  ;;  %p18_p3 = scmp.ge.s32.totalorder %s747_s15, 4   ;;  %s1019_s9 = smov %s688_s10 }
  0x90   : > { %s1020_s10 = smov %s692_s11  ;;  %s1021_s11 = smov %s759_s18 }
  0x91   : > { %s1022_s12 = smov %s747_s15  ;;  %20 = sbr.rel (!%p18_p3) target bundleno = 7 (0x7), region = 86 }
  0x98   :  { %404 = vsyncpa [#allocation3], 1 }
  0x99   :  { %406 = vsyncpa [#allocation3 + $0x1], 1 }
  0x9a   :  { %407 = vsyncpa [#allocation6], 1 }
  0x9b   :  { %409 = vsyncpa [#allocation6 + $0x1], 1 }
  0x9c   :  { %410 = vsyncpa [#allocation4], 1 }
  0x9d   :  { %412 = vsyncpa [#allocation4 + $0x1], 1 }

</bundles_post_ra>
